<compile_context>
chip_gen: v6e
topology: v6e:2x2x1
jax: 0.10.0
libtpu: 0.0.40
codegen_flags: <defaults>
</compile_context>

<pallas_src>
import jax
import jax.numpy as jnp
from jax import lax
from jax.experimental import pallas as pl
from jax.experimental.pallas import tpu as pltpu


def _pair(v):
    if isinstance(v, (tuple, list)):
        assert len(v) == 2
        return int(v[0]), int(v[1])
    return int(v), int(v)


def _cdiv(a, b):
    return -(-a // b)


def _round_up(x, m):
    return _cdiv(x, m) * m


def _vmem_capacity_bytes():
    """Best-effort query of per-core VMEM capacity (fallback: v7x-safe 64 MiB)."""
    try:
        info = pltpu.get_tpu_info()
        for attr in ("vmem_capacity_bytes", "vmem_bytes", "vmem_size_bytes"):
            v = getattr(info, attr, None)
            if v:
                return int(v)
    except Exception:
        pass
    return 64 * 1024 * 1024


def _make_kernel(*, taps, n_planes, toh, ow, ic, oc_pad):
    """Fused (packed-K im2col + single MXU matmul) conv kernel body.

    taps: static list of (plane_index, row_offset, col_offset) in the K order
          matching the packed weight (tap-major, ic-minor).
    """

    def kernel(x_ref, w_ref, out_ref):
        # x_ref:   (n_planes, th, wc, ic)   halo'd phase-split input tile
        # w_ref:   (kh*kw*ic, oc_pad)       resident packed weight
        # out_ref: (toh, ow, oc_pad)
        #
        # Unaligned sublane slicing and the lane-dim concat are done on 32-bit
        # values (cheap at tile scale); the MXU operands are cast back to the
        # compute dtype right before the single dot.
        planes = [x_ref[p].astype(jnp.float32) for p in range(n_planes)]
        cols = []
        for plane, qi, qj in taps:
            xt = planes[plane][qi:qi + toh, qj:qj + ow, :]      # (toh, ow, ic)
            cols.append(xt.reshape(toh * ow, ic))
        lhs = cols[0] if len(cols) == 1 else jnp.concatenate(cols, axis=-1)
        lhs = lhs.astype(w_ref.dtype)                           # (toh*ow, kh*kw*ic)

        res = jnp.dot(lhs, w_ref[...], preferred_element_type=jnp.float32)
        out_ref[...] = res.reshape(toh, ow, oc_pad).astype(out_ref.dtype)

    return kernel


def decomposed_conv2d_forward(
    x, coefs, basis, out_channels, in_channels, kernel_size,
    stride, padding=0, dilation=1,
    *, compute_dtype=jnp.bfloat16, channels_last_output=False,
    target_rows=None, slab_budget_bytes=None, vmem_limit_bytes=None,
):
    kh, kw = _pair(kernel_size)
    sh, sw = _pair(stride)
    ph, pw = _pair(padding)
    dh, dw = _pair(dilation)

    n, ic, h, w = x.shape
    oc = int(out_channels)
    nb = int(basis.shape[0])
    assert ic == in_channels
    assert coefs.shape == (oc * ic, nb)

    oh = (h + 2 * ph - dh * (kh - 1) - 1) // sh + 1
    ow = (w + 2 * pw - dw * (kw - 1) - 1) // sw + 1
    assert oh > 0 and ow > 0
    qh_max = ((kh - 1) * dh) // sh
    qw_max = ((kw - 1) * dw) // sw

    # Lane-dense output channels (unmasked stores).
    oc_pad = _round_up(max(oc, 1), 128)

    # -------- Generation-aware budgets (v5e/v6e: 128 MiB VMEM, v7x: 64 MiB). --
    cap = _vmem_capacity_bytes()
    big_vmem = cap >= 100 * 1024 * 1024
    if vmem_limit_bytes is None:
        vmem_limit_bytes = (96 if big_vmem else 40) * 1024 * 1024
    if target_rows is None:
        target_rows = 1024 if big_vmem else 512
    if slab_budget_bytes is None:
        slab_budget_bytes = vmem_limit_bytes // 4

    # -------- Stride-phase decomposition of the taps. -------------------------
    taps_phase = []
    for i in range(kh):
        for j in range(kw):
            pi, qi = (i * dh) % sh, (i * dh) // sh
            pj, qj = (j * dw) % sw, (j * dw) // sw
            taps_phase.append((pi * sw + pj, qi, qj))
    used_planes = sorted({p for p, _, _ in taps_phase})
    plane_pos = {p: k for k, p in enumerate(used_planes)}
    n_planes = len(used_planes)
    taps = [(plane_pos[p], qi, qj) for p, qi, qj in taps_phase]

    # Coarse (phase-split) spatial extents.
    wc = max(_cdiv(w + 2 * pw, sw), ow + qw_max)

    # -------- Output-row tile selection. --------------------------------------
    x_itemsize = jnp.dtype(compute_dtype).itemsize

    def _step_bytes(t):
        in_b = n_planes * (t + qh_max) * wc * ic * x_itemsize
        out_b = t * ow * oc_pad * 4
        return 2 * in_b + 2 * out_b            # double-buffered input + output

    toh = max(1, min(oh, target_rows // max(ow, 1)))
    while toh > 1 and _step_bytes(toh) > slab_budget_bytes:
        toh = max(1, toh // 2)
    # Keep >= 2 grid steps so both v7x TensorCores get parallel work.
    if n * _cdiv(oh, toh) < 2 and toh > 1:
        toh = _cdiv(toh, 2)
    n_oh_tiles = _cdiv(oh, toh)
    oh_p = n_oh_tiles * toh
    th = toh + qh_max

    hc = max(_cdiv(h + 2 * ph, sh), oh_p + qh_max)
    hp, wp = hc * sh, wc * sw

    # -------- Input: channels-last + pad + phase-split + halo'd row tiles. ----
    x_nhwc = jnp.transpose(x, (0, 2, 3, 1)).astype(compute_dtype)
    x_pad = jnp.pad(
        x_nhwc, ((0, 0), (ph, hp - h - ph), (pw, wp - w - pw), (0, 0)))
    xs = (
        x_pad.reshape(n, hc, sh, wc, sw, ic)
        .transpose(0, 2, 4, 1, 3, 5)
        .reshape(n, sh * sw, hc, wc, ic)
    )
    xs = xs[:, jnp.asarray(used_planes, jnp.int32)]          # only referenced phases
    # Duplicate the qh_max halo rows per tile so BlockSpec auto-pipelining
    # (double-buffered, megacore-safe) replaces the manual blocking DMA.
    row_idx = jnp.arange(n_oh_tiles)[:, None] * toh + jnp.arange(th)[None, :]
    xs_tiled = jnp.transpose(xs[:, :, row_idx], (0, 2, 1, 3, 4, 5))
    # -> (n, n_oh_tiles, n_planes, th, wc, ic)

    # -------- Weight synthesis (once, in f32) + K packing. ---------------------
    # Matches torch: coefs.reshape(num_basis, OC*IC).transpose(0,1) @ basis.
    tw = (coefs.reshape(nb, oc * ic).T.astype(jnp.float32)
          @ basis.reshape(nb, kh * kw).astype(jnp.float32))          # (OC*IC, KH*KW)
    tw = tw.reshape(oc, ic, kh, kw)
    w_packed = jnp.transpose(tw, (2, 3, 1, 0)).reshape(kh * kw * ic, oc)
    w_packed = jnp.pad(w_packed, ((0, 0), (0, oc_pad - oc))).astype(compute_dtype)

    kernel = _make_kernel(taps=taps, n_planes=n_planes, toh=toh, ow=ow,
                          ic=ic, oc_pad=oc_pad)

    out = pl.pallas_call(
        kernel,
        out_shape=jax.ShapeDtypeStruct((n, oh_p, ow, oc_pad), jnp.float32),
        grid_spec=pltpu.PrefetchScalarGridSpec(
            num_scalar_prefetch=0,
            grid=(n, n_oh_tiles),
            in_specs=[
                # Halo'd input tile for this (batch, row-tile) step.
                pl.BlockSpec((None, None, n_planes, th, wc, ic),
                             lambda a, b: (a, b, 0, 0, 0, 0)),
                # Packed weight, resident in VMEM for all steps.
                pl.BlockSpec((kh * kw * ic, oc_pad), lambda a, b: (0, 0)),
            ],
            out_specs=pl.BlockSpec((None, toh, ow, oc_pad),
                                   lambda a, b: (a, b, 0, 0)),
        ),
        compiler_params=pltpu.CompilerParams(
            dimension_semantics=("parallel", "parallel"),
            vmem_limit_bytes=vmem_limit_bytes,
        ),
    )(xs_tiled, w_packed)

    out = out[:, :oh, :, :oc]                 # drop OH / OC padding
    if channels_last_output:
        return out
    return jnp.transpose(out, (0, 3, 1, 2))   # NCHW to match the PyTorch module


if __name__ == "__main__":
    def _run_and_check(N, IC, OC, H, W, KH, KW, stride, padding, dilation,
                       num_basis, compute_dtype, tol_rel):
        key = jax.random.PRNGKey(0)
        k1, k2, k3 = jax.random.split(key, 3)
        basis = jax.random.normal(k1, (num_basis, KH * KW), jnp.float32)
        coefs = jax.random.normal(k2, (OC * IC, num_basis), jnp.float32)
        x = jax.random.normal(k3, (N, IC, H, W), jnp.float32)

        out = decomposed_conv2d_forward(
            x, coefs, basis, OC, IC, (KH, KW), stride, padding, dilation,
            compute_dtype=compute_dtype)
        out = jax.block_until_ready(out)

        # Pure-JAX reference of the PyTorch forward (bias is None in the module).
        true_w = (coefs.reshape(num_basis, OC * IC).T @ basis).reshape(OC, IC, KH, KW)
        ref = lax.conv_general_dilated(
            x, true_w, (stride, stride),
            [(padding, padding), (padding, padding)],
            rhs_dilation=(dilation, dilation),
            dimension_numbers=("NCHW", "OIHW", "NCHW"),
        )
        assert out.shape == ref.shape, (out.shape, ref.shape)
        scale = max(1.0, float(jnp.max(jnp.abs(ref))))
        rel_err = float(jnp.max(jnp.abs(out - ref))) / scale
        assert rel_err < tol_rel, (rel_err, str(compute_dtype), stride)

    # f32 path: strict check.  bf16 (default) path: looser relative tolerance.
    _run_and_check(2, 4, 8, 16, 16, 3, 3, 1, 1, 1, 2, jnp.float32, 5e-4)
    _run_and_check(2, 4, 8, 16, 16, 3, 3, 1, 1, 1, 2, jnp.bfloat16, 5e-2)
    # stride > 1 exercises the phase-split index math.
    _run_and_check(2, 4, 8, 32, 32, 3, 3, 2, 1, 1, 2, jnp.bfloat16, 5e-2)
    print("KERNEL_OK")
</pallas_src>

<mosaic_0001>
module attributes {stable_mosaic.version = 11 : i64} {
  func.func @kernel(%arg0: i32, %arg1: i32, %arg2: memref<1x1x1x18x18x4xf32, #tpu.memory_space<vmem>>, %arg3: memref<36x128xf32, #tpu.memory_space<vmem>>, %arg4: memref<1x16x16x128xf32, #tpu.memory_space<vmem>>) attributes {dimension_semantics = [#tpu.dimension_semantics<parallel>, #tpu.dimension_semantics<parallel>], iteration_bounds = array<i64: 2, 1>, scalar_prefetch = 0 : i64, scratch_operands = 0 : i64, tpu.core_type = #tpu.core_type<tc>, window_params = [{transform_indices = @transform_0, window_bounds = array<i64: 1, 1, 1, 18, 18, 4>}, {pipeline_mode = #tpu.pipeline_mode<synchronous>, transform_indices = @transform_1, window_bounds = array<i64: 36, 128>}, {transform_indices = @transform_2, window_bounds = array<i64: 1, 16, 16, 128>}]} {
    %c0 = arith.constant 0 : index
    %c0_0 = arith.constant 0 : index
    %c0_1 = arith.constant 0 : index
    %c0_2 = arith.constant 0 : index
    %c0_3 = arith.constant 0 : index
    %c0_4 = arith.constant 0 : index
    %0 = vector.load %arg2[%c0, %c0_0, %c0_1, %c0_2, %c0_3, %c0_4] : memref<1x1x1x18x18x4xf32, #tpu.memory_space<vmem>>, vector<1x1x1x18x18x4xf32>
    %1 = vector.shape_cast %0 : vector<1x1x1x18x18x4xf32> to vector<18x18x4xf32>
    %2 = vector.extract_strided_slice %1 {offsets = [0, 0, 0], sizes = [16, 16, 4], strides = [1, 1, 1]} : vector<18x18x4xf32> to vector<16x16x4xf32>
    %3 = vector.shape_cast %2 : vector<16x16x4xf32> to vector<256x4xf32>
    %4 = vector.extract_strided_slice %1 {offsets = [0, 1, 0], sizes = [16, 16, 4], strides = [1, 1, 1]} : vector<18x18x4xf32> to vector<16x16x4xf32>
    %5 = vector.shape_cast %4 : vector<16x16x4xf32> to vector<256x4xf32>
    %6 = vector.extract_strided_slice %1 {offsets = [0, 2, 0], sizes = [16, 16, 4], strides = [1, 1, 1]} : vector<18x18x4xf32> to vector<16x16x4xf32>
    %7 = vector.shape_cast %6 : vector<16x16x4xf32> to vector<256x4xf32>
    %8 = vector.extract_strided_slice %1 {offsets = [1, 0, 0], sizes = [16, 16, 4], strides = [1, 1, 1]} : vector<18x18x4xf32> to vector<16x16x4xf32>
    %9 = vector.shape_cast %8 : vector<16x16x4xf32> to vector<256x4xf32>
    %10 = vector.extract_strided_slice %1 {offsets = [1, 1, 0], sizes = [16, 16, 4], strides = [1, 1, 1]} : vector<18x18x4xf32> to vector<16x16x4xf32>
    %11 = vector.shape_cast %10 : vector<16x16x4xf32> to vector<256x4xf32>
    %12 = vector.extract_strided_slice %1 {offsets = [1, 2, 0], sizes = [16, 16, 4], strides = [1, 1, 1]} : vector<18x18x4xf32> to vector<16x16x4xf32>
    %13 = vector.shape_cast %12 : vector<16x16x4xf32> to vector<256x4xf32>
    %14 = vector.extract_strided_slice %1 {offsets = [2, 0, 0], sizes = [16, 16, 4], strides = [1, 1, 1]} : vector<18x18x4xf32> to vector<16x16x4xf32>
    %15 = vector.shape_cast %14 : vector<16x16x4xf32> to vector<256x4xf32>
    %16 = vector.extract_strided_slice %1 {offsets = [2, 1, 0], sizes = [16, 16, 4], strides = [1, 1, 1]} : vector<18x18x4xf32> to vector<16x16x4xf32>
    %17 = vector.shape_cast %16 : vector<16x16x4xf32> to vector<256x4xf32>
    %18 = vector.extract_strided_slice %1 {offsets = [2, 2, 0], sizes = [16, 16, 4], strides = [1, 1, 1]} : vector<18x18x4xf32> to vector<16x16x4xf32>
    %19 = vector.shape_cast %18 : vector<16x16x4xf32> to vector<256x4xf32>
    %20 = tpu.concatenate %3, %5, %7, %9, %11, %13, %15, %17, %19 in 1 : vector<256x4xf32>, vector<256x4xf32>, vector<256x4xf32>, vector<256x4xf32>, vector<256x4xf32>, vector<256x4xf32>, vector<256x4xf32>, vector<256x4xf32>, vector<256x4xf32> -> vector<256x36xf32>
    %c0_5 = arith.constant 0 : index
    %c0_6 = arith.constant 0 : index
    %21 = vector.load %arg3[%c0_5, %c0_6] : memref<36x128xf32, #tpu.memory_space<vmem>>, vector<36x128xf32>
    %cst = arith.constant dense<0.000000e+00> : vector<256x128xf32>
    %22 = tpu.matmul %20, %21, %cst {dimension_numbers = #tpu.dot_dimension_numbers<[1], [0], [0], [1], [0, 0, 1, 1], [], []>} : vector<256x36xf32>, vector<36x128xf32>, vector<256x128xf32> -> vector<256x128xf32>
    %23 = vector.shape_cast %22 : vector<256x128xf32> to vector<16x16x128xf32>
    %c0_7 = arith.constant 0 : index
    %c0_8 = arith.constant 0 : index
    %c0_9 = arith.constant 0 : index
    %c0_10 = arith.constant 0 : index
    %24 = vector.load %arg4[%c0_7, %c0_8, %c0_9, %c0_10] : memref<1x16x16x128xf32, #tpu.memory_space<vmem>>, vector<1x16x16x128xf32>
    %25 = vector.shape_cast %24 : vector<1x16x16x128xf32> to vector<16x16x128xf32>
    %26 = vector.shape_cast %23 : vector<16x16x128xf32> to vector<1x16x16x128xf32>
    tpu.vector_store %arg4[%c0_7, %c0_8, %c0_9, %c0_10], %26 {strides = array<i32>} : memref<1x16x16x128xf32, #tpu.memory_space<vmem>>, vector<1x16x16x128xf32>,
    return
  }
  func.func @transform_0(%arg0: i32, %arg1: i32) -> (i32, i32, i32, i32, i32, i32) {
    %c0_i32 = arith.constant 0 : i32
    %c0_i32_0 = arith.constant 0 : i32
    %c0_i32_1 = arith.constant 0 : i32
    %c0_i32_2 = arith.constant 0 : i32
    %c0_i32_3 = arith.constant 0 : i32
    return %arg0, %arg1, %c0_i32, %c0_i32_0, %c0_i32_1, %c0_i32_2 : i32, i32, i32, i32, i32, i32
  }
  func.func @transform_1(%arg0: i32, %arg1: i32) -> (i32, i32) {
    %c0_i32 = arith.constant 0 : i32
    %c0_i32_0 = arith.constant 0 : i32
    %c0_i32_1 = arith.constant 0 : i32
    return %c0_i32, %c0_i32_0 : i32, i32
  }
  func.func @transform_2(%arg0: i32, %arg1: i32) -> (i32, i32, i32, i32) {
    %c0_i32 = arith.constant 0 : i32
    %c0_i32_0 = arith.constant 0 : i32
    %c0_i32_1 = arith.constant 0 : i32
    return %arg0, %arg1, %c0_i32, %c0_i32_0 : i32, i32, i32, i32
  }
}

</mosaic_0001>

<bundles_post_ra>
// kernel: tpu_custom_call.1
= control target key start
LH: loop header
LB: loop body
LE: loop exit
PB: predicated region body
PF: predicated region fallthrough
CT: control target
= control target key end

     0   :  { %7 = vsyncpa [#allocation3], 0  ;;  %s4121_s0 = inlined_call_operand.vmem [shape: f32[2,1,1,18,18,4], index: 0, kind: input, shape index: {}]   ;;  %s4122_s1 = inlined_call_operand.vmem [shape: f32[36,128], index: 1, kind: input, shape index: {}]   ;;  %s4123_s2 = inlined_call_operand.hbm [shape: f32[2,16,16,128], index: 2, kind: output, shape index: {}]  }
   0x1   :  { %9 = vsyncpa [#allocation3 + $0x1], 0  ;;  %s2294_s9 = smov 0   ;;  %s2296_s10 = smov 0  }
   0x2   :  { %s2298_s11 = smov 0   ;;  %s2300_s12 = smov 0  }
   0x3   :  { %s2302_s13 = smov 0   ;;  %s2304_s14 = smov 0  }
   0x4 LB: > { %s1955_s15 = sadd.s32 4294967295, %s2267_s14   ;;  %s1956_s16 = sadd.s32 4294967294, %s2267_s14   ;;  %s2267_s14 = sphi %s2304_s14, %s15_s14   ;;  %s2263_s13 = sphi %s2302_s13, %s4410_s13   ;;  %s2259_s12 = sphi %s2300_s12, %s4409_s12   ;;  %s2255_s11 = sphi %s2298_s11, %s4408_s11   ;;  %s2251_s10 = sphi %s2296_s10, %s4407_s10   ;;  %s2247_s9 = sphi %s2294_s9, %s4406_s9  }
   0x5   : > { %s27_s17 = sadd.s32 1, %s2263_s13  ;;  %s85_s18 = sadd.s32 1, %s2255_s11 }
   0x6   : > { %p29_p0 = scmp.ge.s32.totalorder %s27_s17, 2  ;;  %p95_p1 = scmp.ne.s32.totalorder %s2255_s11, %s2251_s10 }
   0x7   : > { %p96_p2 = scmp.eq.s32.totalorder %s1955_s15, 1  ;;  %p101_p3 = scmp.ne.s32.totalorder %s2251_s10, %s2247_s9 }
   0x8   : > { %s4412_s17 = smov (%p29_p0, %s27_s17), 0  ;;  %p102_p5 = scmp.eq.s32.totalorder %s1956_s16, 1 }
   0x9   : > { %p2334_p4 = por %p96_p2, %p95_p1  ;;  %s80_s20 = ssub.s32 %s2263_s13, %s4412_s17 }
   0xa   : > { %p1959_p6 = scmp.ge.s32.totalorder %s2267_s14, 1  ;;  %p83_p7 = scmp.eq.s32.totalorder %s80_s20, 0 }
   0xb   : > { %p2341_p8 = por %p102_p5, %p101_p3  ;;  %p135_p9 = scmp.lt.s32.totalorder %s2267_s14, 3 }
   0xc   : > { %s2347_s22 = scalar_select %p83_p7, %s2255_s11, %s85_s18  }
   0xd   : > { %p136_p10 = pnand %p1959_p6, %p135_p9 }
   0xf   : > { %139 = sbr.rel (%p136_p10) target bundleno = 865 (0x361), region = 28 }
  0x14   : > { %p161_p11 = scmp.lt.s32.totalorder %s2259_s12, 1  ;;  %vm273_vm0 = vcmask 1046528   ;;  %s2269_s28 = smov 4   ;;  %vm354_vm1 = vcmask 1045504   ;;  %vm1229_vm2 = vcmask 31744   ;;  %vm1262_vm3 = vcmask 64512  }
  0x15   : > { %s2270_s29 = smov 8   ;;  %s2271_s30 = smov 12   ;;  %vm1595_vm4 = vcmask 1043456   ;;  %vm1295_vm5 = vcmask 97280   ;;  %vm1328_vm6 = vcmask 130048   ;;  %vm1361_vm7 = vcmask 162816  }
  0x16   : > { %s162_s23 = scalar_select %p161_p11, %s2259_s12, 1  ;;  %vm1394_vm8 = vcmask 195584   ;;  %vm1427_vm9 = vcmask 228352   ;;  %vm1460_vm10 = vcmask 261120   ;;  %vm1498_vm11 = vcmask 293888  }
  0x17   : > { %s2272_s3 = smov 16   ;;  %s2273_s4 = smov 20  }
  0x18   : > { %s2106_s24 = smul.u32 432, %s162_s23  ;;  %s2274_s5 = smov 24  }
  0x19   : > { %s2275_s16 = smov 28  }
  0x1a   : > { %s2354_s27 = scalar_lea.vmem %s4121_s0, %s2106_s24 }
  0x1b   : > { %v2357_v0 = vld [vmem:[%s2354_s27 + $0x18] sm:$0xff]  ;;  %v2360_v1 = vld [vmem:[%s2354_s27 + $0x20] sm:$0xff]  ;;  %v2368_v5 = vld [vmem:[%s2354_s27 + $0x8] sm:$0xff] }
  0x1c   : > { %v2363_v2 = vld [vmem:[%s2354_s27] sm:$0xff]  ;;  %v279_v3 = vrot.slane %v2357_v0, 1  ;;  %v280_v4 = vrot.slane %v2360_v1, 1  ;;  %v2372_v7 = vld [vmem:[%s2354_s27 + $0x28] sm:$0x3]  ;;  %v275_v8 = vrot.slane %v2368_v5, 1 }
  0x1d   : > { %v274_v6 = vrot.slane %v2363_v2, 1  ;;  %v282_v9 = vrot.slane %v2372_v7, 1  ;;  %v2377_v10 = vld [vmem:[%s2354_s27 + $0x10] sm:$0x3]  ;;  %v2380_v11 = vld [vmem:[%s2354_s27 + $0x38] sm:$0xff]  ;;  %v2410_v24 = vld [vmem:[%s2354_s27 + $0x48] sm:$0xff] }
  0x1e   : > { %4234 = vst [vmem:[#allocation5_spill] sm:$0xff] %v2380_v11  ;;  %v2383_v12 = vsel %vm273_vm0, %v279_v3, %v280_v4  ;;  %v277_v13 = vrot.slane %v2377_v10, 1  ;;  %v2387_v14 = vld [vmem:[%s2354_s27 + $0x40] sm:$0x3]  ;;  %v2390_v15 = vld [vmem:[%s2354_s27 + $0x30] sm:$0xff]  ;;  %v285_v18 = vrot.slane %v2380_v11, 1 }
  0x1f   : > { %465 = vrot.lane.b32.xlu1 %v2383_v12, %s2269_s28  ;;  %v276_v16 = vsel %vm273_vm0, %v274_v6, %v275_v8  ;;  %v2397_v17 = vsel %vm273_vm0, %v280_v4, %v282_v9  ;;  %v287_v19 = vrot.slane %v2387_v14, 1  ;;  %v284_v21 = vrot.slane %v2390_v15, 1  ;;  %v2404_v22 = vld [vmem:[%s2354_s27 + $0x50] sm:$0xff]  ;;  %v2407_v23 = vld [vmem:[%s2354_s27 + $0x58] sm:$0x3]  ;;  %v2425_v30 = vld [vmem:[%s2354_s27 + $0x68] sm:$0xff] }
  0x20   : > { %461 = vrot.lane.b32.xlu0 %v276_v16, %s2269_s28  ;;  %v278_v20 = vsel %vm273_vm0, %v275_v8, %v277_v13  ;;  %v290_v26 = vrot.slane %v2404_v22, 1  ;;  %v292_v27 = vrot.slane %v2407_v23, 1  ;;  %v289_v29 = vrot.slane %v2410_v24, 1  ;;  %v2428_v31 = vld [vmem:[%s2354_s27 + $0x70] sm:$0x3]  ;;  %v2431_v32 = vld [vmem:[%s2354_s27 + $0x60] sm:$0xff] }
  0x21   : > { %v2416_v25 = vsel %vm273_vm0, %v285_v18, %v287_v19  ;;  %v2421_v28 = vsel %vm273_vm0, %v284_v21, %v285_v18  ;;  %v295_v34 = vrot.slane %v2425_v30, 1  ;;  %v297_v35 = vrot.slane %v2428_v31, 1  ;;  %v2447_v38 = vld [vmem:[%s2354_s27 + $0x80] sm:$0xff]  ;;  %v2450_v39 = vld [vmem:[%s2354_s27 + $0x88] sm:$0x3]  ;;  %v2453_v40 = vld [vmem:[%s2354_s27 + $0x78] sm:$0xff] }
  0x22   : > { %v2438_v33 = vsel %vm273_vm0, %v290_v26, %v292_v27  ;;  %v2443_v36 = vsel %vm273_vm0, %v289_v29, %v290_v26  ;;  %v294_v37 = vrot.slane %v2431_v32, 1  ;;  %v300_v42 = vrot.slane %v2447_v38, 1  ;;  %v2469_v46 = vld [vmem:[%s2354_s27 + $0x98] sm:$0xff]  ;;  %v2472_v47 = vld [vmem:[%s2354_s27 + $0xa0] sm:$0x3]  ;;  %v2475_v48 = vld [vmem:[%s2354_s27 + $0x90] sm:$0xff] }
  0x23   : > { %467 = vrot.lane.b32.xlu1 %v2397_v17, %s2269_s28  ;;  %4235 = vst [vmem:[#allocation6_spill] sm:$0xff] %v2443_v36  ;;  %v2460_v41 = vsel %vm273_vm0, %v295_v34, %v297_v35  ;;  %v302_v43 = vrot.slane %v2450_v39, 1  ;;  %v299_v45 = vrot.slane %v2453_v40, 1  ;;  %v305_v50 = vrot.slane %v2469_v46, 1  ;;  %v2491_v54 = vld [vmem:[%s2354_s27 + $0xb0] sm:$0xff]  ;;  %v2497_v56 = vld [vmem:[%s2354_s27 + $0xa8] sm:$0xff] }
  0x24   : > { %463 = vrot.lane.b32.xlu0 %v278_v20, %s2269_s28  ;;  %4236 = vst [vmem:[#allocation7_spill] sm:$0xff] %v2460_v41  ;;  %v2465_v44 = vsel %vm273_vm0, %v294_v37, %v295_v34  ;;  %v307_v51 = vrot.slane %v2472_v47, 1  ;;  %v304_v53 = vrot.slane %v2475_v48, 1  ;;  %v2494_v55 = vld [vmem:[%s2354_s27 + $0xb8] sm:$0x3]  ;;  %v310_v58 = vrot.slane %v2491_v54, 1 }
  0x25   : > { %4237 = vst [vmem:[#allocation8_spill] sm:$0xff] %v2465_v44  ;;  %v2482_v49 = vsel %vm273_vm0, %v300_v42, %v302_v43  ;;  %v2487_v52 = vsel %vm273_vm0, %v299_v45, %v300_v42  ;;  %v312_v59 = vrot.slane %v2494_v55, 1  ;;  %v309_v61 = vrot.slane %v2497_v56, 1  ;;  %v2513_v62 = vld [vmem:[%s2354_s27 + $0xc8] sm:$0xff]  ;;  %v2516_v63 = vld [vmem:[%s2354_s27 + $0xd0] sm:$0x3] }
  0x26   : > { %4238 = vst [vmem:[#allocation9_spill] sm:$0xff] %v2482_v49  ;;  %4239 = vst [vmem:[#allocation10_spill] sm:$0xff] %v2487_v52  ;;  %v2504_v57 = vsel %vm273_vm0, %v305_v50, %v307_v51  ;;  %v2509_v60 = vsel %vm273_vm0, %v304_v53, %v305_v50  ;;  %v2519_v3 = vld [vmem:[%s2354_s27 + $0xc0] sm:$0xff]  ;;  %v315_v6 = vrot.slane %v2513_v62, 1  ;;  %v317_v8 = vrot.slane %v2516_v63, 1  ;;  %v2541_v19 = vld [vmem:[%s2354_s27 + $0xd8] sm:$0xff] }
  0x27   : > { %471 = vrot.lane.b32.xlu1 %v2416_v25, %s2269_s28  ;;  %4240 = vst [vmem:[#allocation11_spill] sm:$0xff] %v2504_v57  ;;  %4241 = vst [vmem:[#allocation12_spill] sm:$0xff] %v2509_v60  ;;  %v2526_v4 = vsel %vm273_vm0, %v310_v58, %v312_v59  ;;  %v2531_v9 = vsel %vm273_vm0, %v309_v61, %v310_v58  ;;  %v314_v13 = vrot.slane %v2519_v3, 1  ;;  %v2535_v16 = vld [vmem:[%s2354_s27 + $0xe0] sm:$0xff]  ;;  %v2538_v18 = vld [vmem:[%s2354_s27 + $0xe8] sm:$0x3] }
  0x28   : > { %469 = vrot.lane.b32.xlu0 %v2421_v28, %s2269_s28  ;;  %4242 = vst [vmem:[#allocation13_spill] sm:$0xff] %v2526_v4  ;;  %4243 = vst [vmem:[#allocation14_spill] sm:$0xff] %v2531_v9  ;;  %v2548_v20 = vsel %vm273_vm0, %v315_v6, %v317_v8  ;;  %v320_v21 = vrot.slane %v2535_v16, 1  ;;  %v322_v26 = vrot.slane %v2538_v18, 1  ;;  %v319_v29 = vrot.slane %v2541_v19, 1  ;;  %v2557_v34 = vld [vmem:[%s2354_s27 + $0xf8] sm:$0xff] }
  0x29   : > { %4244 = vst [vmem:[#allocation15_spill] sm:$0xff] %v2548_v20  ;;  %v2553_v27 = vsel %vm273_vm0, %v314_v13, %v315_v6  ;;  %v2560_v35 = vld [vmem:[%s2354_s27 + $0x100] sm:$0x3]  ;;  %v2563_v37 = vld [vmem:[%s2354_s27 + $0xf0] sm:$0xff]  ;;  %v325_v43 = vrot.slane %v2557_v34, 1  ;;  %v2585_v59 = vld [vmem:[%s2354_s27 + $0x108] sm:$0xff] }
  0x2a   : > { %4245 = vst [vmem:[#allocation16_spill] sm:$0xff] %v2553_v27  ;;  %v2570_v42 = vsel %vm273_vm0, %v320_v21, %v322_v26  ;;  %v327_v45 = vrot.slane %v2560_v35, 1  ;;  %v2575_v50 = vsel %vm273_vm0, %v319_v29, %v320_v21  ;;  %v324_v51 = vrot.slane %v2563_v37, 1  ;;  %v2579_v53 = vld [vmem:[%s2354_s27 + $0x110] sm:$0xff]  ;;  %v2582_v58 = vld [vmem:[%s2354_s27 + $0x118] sm:$0x3] }
  0x2b   : > { %475 = vrot.lane.b32.xlu1 %v2438_v33, %s2269_s28  ;;  %4246 = vst [vmem:[#allocation17_spill] sm:$0xff] %v2570_v42  ;;  %4247 = vst [vmem:[#allocation18_spill] sm:$0xff] %v2575_v50  ;;  %v330_v6 = vrot.slane %v2579_v53, 1  ;;  %v332_v8 = vrot.slane %v2582_v58, 1  ;;  %v329_v21 = vrot.slane %v2585_v59, 1  ;;  %v2601_v26 = vld [vmem:[%s2354_s27 + $0x128] sm:$0xff] }
  0x2c   : > { %473 = vrot.lane.b32.xlu0 %v2443_v36, %s2269_s28  ;;  %v2592_v61 = vsel %vm273_vm0, %v325_v43, %v327_v45  ;;  %v2597_v13 = vsel %vm273_vm0, %v324_v51, %v325_v43  ;;  %v2604_v29 = vld [vmem:[%s2354_s27 + $0x130] sm:$0x3]  ;;  %v335_v43 = vrot.slane %v2601_v26, 1 }
  0x2d   : > { %4248 = vst [vmem:[#allocation19_spill] sm:$0xff] %v2592_v61  ;;  %4249 = vst [vmem:[#allocation20_spill] sm:$0xff] %v2597_v13  ;;  %v2614_v45 = vsel %vm273_vm0, %v330_v6, %v332_v8  ;;  %v337_v51 = vrot.slane %v2604_v29, 1 }
  0x2e   : > { %4250 = vst [vmem:[#allocation21_spill] sm:$0xff] %v2614_v45 }
  0x2f   : > { %479 = vrot.lane.b32.xlu1 %v2460_v41, %s2269_s28  ;;  %v2636_v8 = vsel %vm273_vm0, %v335_v43, %v337_v51 }
  0x30   : > { %477 = vrot.lane.b32.xlu0 %v2465_v44, %s2269_s28  ;;  %4252 = vst [vmem:[#allocation23_spill] sm:$0xff] %v2636_v8  ;;  %v2670_v44 = vld [vmem:[%s2354_s27 + $0x178] sm:$0x3] }
  0x33   : > { %483 = vrot.lane.b32.xlu1 %v2482_v49, %s2269_s28  ;;  %v2667_v49 = vld [vmem:[%s2354_s27 + $0x170] sm:$0xff] }
  0x34   : > { %481 = vrot.lane.b32.xlu0 %v2487_v52, %s2269_s28 }
  0x37   : > { %487 = vrot.lane.b32.xlu1 %v2504_v57, %s2269_s28 }
  0x38   : > { %485 = vrot.lane.b32.xlu0 %v2509_v60, %s2269_s28  ;;  %v2645_v60 = vld [vmem:[%s2354_s27 + $0x158] sm:$0xff] }
  0x3b   : > { %491 = vrot.lane.b32.xlu1 %v2526_v4, %s2269_s28 }
  0x3c   : > { %489 = vrot.lane.b32.xlu0 %v2531_v9, %s2269_s28 }
  0x3f   : > { %495 = vrot.lane.b32.xlu1 %v2548_v20, %s2269_s28  ;;  %v2623_v20 = vld [vmem:[%s2354_s27 + $0x140] sm:$0xff] }
  0x40   : > { %493 = vrot.lane.b32.xlu0 %v2553_v27, %s2269_s28 }
  0x43   : > { %499 = vrot.lane.b32.xlu1 %v2570_v42, %s2269_s28  ;;  %v2619_v42 = vsel %vm273_vm0, %v329_v21, %v330_v6  ;;  %v340_v6 = vrot.slane %v2623_v20, 1 }
  0x44   : > { %497 = vrot.lane.b32.xlu0 %v2575_v50, %s2269_s28  ;;  %v2607_v50 = vld [vmem:[%s2354_s27 + $0x120] sm:$0xff]  ;;  %4251 = vst [vmem:[#allocation22_spill] sm:$0xff] %v2619_v42 }
  0x45   : > { %v334_v27 = vrot.slane %v2607_v50, 1 }
  0x47   : > { %503 = vrot.lane.b32.xlu1 %v2592_v61, %s2269_s28  ;;  %v2626_v61 = vld [vmem:[%s2354_s27 + $0x148] sm:$0x3]  ;;  %v2641_v9 = vsel %vm273_vm0, %v334_v27, %v335_v43  ;;  %v345_v27 = vrot.slane %v2645_v60, 1 }
  0x48   : > { %501 = vrot.lane.b32.xlu0 %v2597_v13, %s2269_s28  ;;  %v2629_v13 = vld [vmem:[%s2354_s27 + $0x138] sm:$0xff]  ;;  %v342_v21 = vrot.slane %v2626_v61, 1  ;;  %4253 = vst [vmem:[#allocation24_spill] sm:$0xff] %v2641_v9 }
  0x49   : > { %v339_v4 = vrot.slane %v2629_v13, 1 }
  0x4a   : > { %v2658_v51 = vsel %vm273_vm0, %v340_v6, %v342_v21 }
  0x4b   : > { %507 = vrot.lane.b32.xlu1 %v2614_v45, %s2269_s28  ;;  %v2648_v45 = vld [vmem:[%s2354_s27 + $0x160] sm:$0x3]  ;;  %4254 = vst [vmem:[#allocation25_spill] sm:$0xff] %v2658_v51  ;;  %v2663_v57 = vsel %vm273_vm0, %v339_v4, %v340_v6  ;;  %v350_v4 = vrot.slane %v2667_v49, 1  ;;  %v352_v6 = vrot.slane %v2670_v44, 1 }
  0x4c   : > { %505 = vrot.lane.b32.xlu0 %v2619_v42, %s2269_s28  ;;  %v2651_v42 = vld [vmem:[%s2354_s27 + $0x150] sm:$0xff]  ;;  %v347_v43 = vrot.slane %v2648_v45, 1  ;;  %4255 = vst [vmem:[#allocation26_spill] sm:$0xff] %v2663_v57 }
  0x4d   : > { %v344_v52 = vrot.slane %v2651_v42, 1 }
  0x4e   : > { %v2680_v21 = vsel %vm273_vm0, %v345_v27, %v347_v43  ;;  %v356_v43 = vrot.slane %v2368_v5, 2  ;;  %v363_v5 = vrot.slane %v2372_v7, 2  ;;  %v365_v7 = vrot.slane %v2390_v15, 2 }
  0x4f   : > { %511 = vrot.lane.b32.xlu1 %v2636_v8, %s2269_s28  ;;  %v2673_v8 = vld [vmem:[%s2354_s27 + $0x168] sm:$0xff]  ;;  %4257 = vst [vmem:[#allocation28_spill] sm:$0xff] %v2680_v21 }
  0x50   : > { %509 = vrot.lane.b32.xlu0 %v2641_v9, %s2269_s28  ;;  %4256 = vst [vmem:[#allocation27_spill] sm:$0xff] %v2673_v8  ;;  %v2685_v9 = vsel %vm273_vm0, %v344_v52, %v345_v27  ;;  %v349_v41 = vrot.slane %v2673_v8, 1  ;;  %v355_v52 = vrot.slane %v2363_v2, 2 }
  0x51   : > { %4258 = vst [vmem:[#allocation29_spill] sm:$0xff] %v2685_v9 }
  0x52   : > { %v2698_v36 = vsel %vm273_vm0, %v349_v41, %v350_v4  ;;  %v360_v41 = vrot.slane %v2357_v0, 2 }
  0x53   : > { %515 = vrot.lane.b32.xlu1 %v2658_v51, %s2269_s28  ;;  %v2693_v51 = vsel %vm273_vm0, %v350_v4, %v352_v6  ;;  %4260 = vst [vmem:[#allocation31_spill] sm:$0xff] %v2698_v36  ;;  %v361_v6 = vrot.slane %v2360_v1, 2  ;;  %v366_v4 = vrot.slane %v2380_v11, 2 }
  0x54   : > { %513 = vrot.lane.b32.xlu0 %v2663_v57, %s2269_s28  ;;  %4259 = vst [vmem:[#allocation30_spill] sm:$0xff] %v2693_v51  ;;  %v358_v57 = vrot.slane %v2377_v10, 2  ;;  %v357_v10 = vsel %vm354_vm1, %v355_v52, %v356_v43  ;;  %v371_v52 = vrot.slane %v2404_v22, 2 }
  0x55   : > { %v2713_v2 = vsel %vm354_vm1, %v361_v6, %v363_v5 }
  0x56   : > { %v359_v27 = vsel %vm354_vm1, %v356_v43, %v358_v57  ;;  %v368_v57 = vrot.slane %v2387_v14, 2  ;;  %v2731_v14 = vsel %vm354_vm1, %v365_v7, %v366_v4  ;;  %v381_v7 = vrot.slane %v2447_v38, 2 }
  0x57   : > { %519 = vrot.lane.b32.xlu1 %v2680_v21, %s2269_s28  ;;  %4262 = vst [vmem:[#allocation33_spill] sm:$0xff] %v2731_v14  ;;  %v393_v21 = vrot.slane %v2494_v55, 2 }
  0x58   : > { %517 = vrot.lane.b32.xlu0 %v2685_v9, %s2269_s28  ;;  %v2726_v43 = vsel %vm354_vm1, %v366_v4, %v368_v57  ;;  %v375_v4 = vrot.slane %v2431_v32, 2  ;;  %v398_v9 = vrot.slane %v2516_v63, 2 }
  0x59   : > { %4261 = vst [vmem:[#allocation32_spill] sm:$0xff] %v2726_v43 }
  0x5b   : > { %523 = vrot.lane.b32.xlu1 %v2693_v51, %s2269_s28  ;;  %v2718_v51 = vsel %vm354_vm1, %v360_v41, %v361_v6  ;;  %v370_v6 = vrot.slane %v2410_v24, 2  ;;  %v378_v41 = vrot.slane %v2428_v31, 2 }
  0x5c   : > { %521 = vrot.lane.b32.xlu0 %v2698_v36, %s2269_s28  ;;  %v388_v36 = vrot.slane %v2472_v47, 2  ;;  %s2276_s28 = smov 32  }
  0x5f   : > { %559 = vrot.lane.b32.xlu1 %v359_v27, %s2270_s29  ;;  %v373_v27 = vrot.slane %v2407_v23, 2  ;;  %v2744_v23 = vsel %vm354_vm1, %v370_v6, %v371_v52 }
  0x60   : > { %557 = vrot.lane.b32.xlu0 %v357_v10, %s2270_s29  ;;  %v376_v10 = vrot.slane %v2425_v30, 2  ;;  %4264 = vst [vmem:[#allocation35_spill] sm:$0xff] %v2744_v23 }
  0x61   : > { %v2739_v5 = vsel %vm354_vm1, %v371_v52, %v373_v27  ;;  %v383_v27 = vrot.slane %v2450_v39, 2  ;;  %v380_v52 = vrot.slane %v2453_v40, 2 }
  0x62   : > { %4263 = vst [vmem:[#allocation34_spill] sm:$0xff] %v2739_v5  ;;  %v2752_v57 = vsel %vm354_vm1, %v376_v10, %v378_v41  ;;  %v2757_v31 = vsel %vm354_vm1, %v375_v4, %v376_v10  ;;  %v386_v41 = vrot.slane %v2469_v46, 2  ;;  %v385_v10 = vrot.slane %v2475_v48, 2 }
  0x63   : > { %563 = vrot.lane.b32.xlu1 %v2713_v2, %s2270_s29  ;;  %4265 = vst [vmem:[#allocation36_spill] sm:$0xff] %v2752_v57  ;;  %4266 = vst [vmem:[#allocation37_spill] sm:$0xff] %v2757_v31  ;;  %v2765_v6 = vsel %vm354_vm1, %v381_v7, %v383_v27  ;;  %v2770_v39 = vsel %vm354_vm1, %v380_v52, %v381_v7  ;;  %v391_v27 = vrot.slane %v2491_v54, 2  ;;  %v390_v7 = vrot.slane %v2497_v56, 2 }
  0x64   : > { %561 = vrot.lane.b32.xlu0 %v2718_v51, %s2270_s29  ;;  %4267 = vst [vmem:[#allocation38_spill] sm:$0xff] %v2765_v6  ;;  %4268 = vst [vmem:[#allocation39_spill] sm:$0xff] %v2770_v39  ;;  %v2778_v4 = vsel %vm354_vm1, %v386_v41, %v388_v36  ;;  %v2783_v47 = vsel %vm354_vm1, %v385_v10, %v386_v41  ;;  %v396_v36 = vrot.slane %v2513_v62, 2  ;;  %v395_v41 = vrot.slane %v2519_v3, 2 }
  0x65   : > { %4269 = vst [vmem:[#allocation40_spill] sm:$0xff] %v2778_v4  ;;  %4270 = vst [vmem:[#allocation41_spill] sm:$0xff] %v2783_v47  ;;  %v2791_v52 = vsel %vm354_vm1, %v391_v27, %v393_v21  ;;  %v2796_v55 = vsel %vm354_vm1, %v390_v7, %v391_v27  ;;  %v401_v21 = vrot.slane %v2535_v16, 2  ;;  %v400_v27 = vrot.slane %v2541_v19, 2 }
  0x66   : > { %4271 = vst [vmem:[#allocation42_spill] sm:$0xff] %v2791_v52  ;;  %4272 = vst [vmem:[#allocation43_spill] sm:$0xff] %v2796_v55  ;;  %v2804_v10 = vsel %vm354_vm1, %v396_v36, %v398_v9  ;;  %v2809_v63 = vsel %vm354_vm1, %v395_v41, %v396_v36  ;;  %v406_v9 = vrot.slane %v2557_v34, 2  ;;  %v405_v36 = vrot.slane %v2563_v37, 2 }
  0x67   : > { %567 = vrot.lane.b32.xlu1 %v2726_v43, %s2270_s29  ;;  %4273 = vst [vmem:[#allocation44_spill] sm:$0xff] %v2804_v10  ;;  %4274 = vst [vmem:[#allocation45_spill] sm:$0xff] %v2809_v63 }
  0x68   : > { %565 = vrot.lane.b32.xlu0 %v2731_v14, %s2270_s29 }
  0x6b   : > { %571 = vrot.lane.b32.xlu1 %v2739_v5, %s2270_s29 }
  0x6c   : > { %569 = vrot.lane.b32.xlu0 %v2744_v23, %s2270_s29 }
  0x6f   : > { %575 = vrot.lane.b32.xlu1 %v2752_v57, %s2270_s29 }
  0x70   : > { %573 = vrot.lane.b32.xlu0 %v2757_v31, %s2270_s29 }
  0x73   : > { %579 = vrot.lane.b32.xlu1 %v2765_v6, %s2270_s29 }
  0x74   : > { %577 = vrot.lane.b32.xlu0 %v2770_v39, %s2270_s29 }
  0x77   : > { %583 = vrot.lane.b32.xlu1 %v2778_v4, %s2270_s29  ;;  %v403_v4 = vrot.slane %v2538_v18, 2  ;;  %v2822_v18 = vsel %vm354_vm1, %v400_v27, %v401_v21 }
  0x78   : > { %581 = vrot.lane.b32.xlu0 %v2783_v47, %s2270_s29  ;;  %v428_v47 = vrot.slane %v2648_v45, 2  ;;  %v431_v45 = vrot.slane %v2667_v49, 2 }
  0x79   : > { %v2817_v7 = vsel %vm354_vm1, %v401_v21, %v403_v4  ;;  %v411_v4 = vrot.slane %v2579_v53, 2  ;;  %v410_v21 = vrot.slane %v2585_v59, 2 }
  0x7b   : > { %587 = vrot.lane.b32.xlu1 %v2791_v52, %s2270_s29  ;;  %v408_v52 = vrot.slane %v2560_v35, 2  ;;  %v2835_v35 = vsel %vm354_vm1, %v405_v36, %v406_v9 }
  0x7c   : > { %585 = vrot.lane.b32.xlu0 %v2796_v55, %s2270_s29  ;;  %4276 = vst [vmem:[#allocation47_spill] sm:$0xff] %v2835_v35  ;;  %v423_v55 = vrot.slane %v2626_v61, 2 }
  0x7d   : > { %v2830_v41 = vsel %vm354_vm1, %v406_v9, %v408_v52  ;;  %v416_v52 = vrot.slane %v2601_v26, 2  ;;  %v415_v9 = vrot.slane %v2607_v50, 2 }
  0x7e   : > { %4275 = vst [vmem:[#allocation46_spill] sm:$0xff] %v2830_v41 }
  0x7f   : > { %591 = vrot.lane.b32.xlu1 %v2804_v10, %s2270_s29  ;;  %v413_v10 = vrot.slane %v2582_v58, 2  ;;  %v2848_v58 = vsel %vm354_vm1, %v410_v21, %v411_v4 }
  0x80   : > { %589 = vrot.lane.b32.xlu0 %v2809_v63, %s2270_s29  ;;  %v418_v63 = vrot.slane %v2604_v29, 2  ;;  %4278 = vst [vmem:[#allocation49_spill] sm:$0xff] %v2848_v58  ;;  %v2861_v29 = vsel %vm354_vm1, %v415_v9, %v416_v52 }
  0x81   : > { %v2843_v27 = vsel %vm354_vm1, %v411_v4, %v413_v10  ;;  %v421_v10 = vrot.slane %v2623_v20, 2  ;;  %4280 = vst [vmem:[#allocation51_spill] sm:$0xff] %v2861_v29  ;;  %v420_v4 = vrot.slane %v2629_v13, 2 }
  0x82   : > { %4277 = vst [vmem:[#allocation48_spill] sm:$0xff] %v2843_v27  ;;  %v2856_v36 = vsel %vm354_vm1, %v416_v52, %v418_v63  ;;  %v426_v63 = vrot.slane %v2645_v60, 2  ;;  %v425_v52 = vrot.slane %v2651_v42, 2 }
  0x83   : > { %595 = vrot.lane.b32.xlu1 %v2817_v7, %s2270_s29  ;;  %4279 = vst [vmem:[#allocation50_spill] sm:$0xff] %v2856_v36  ;;  %v2869_v21 = vsel %vm354_vm1, %v421_v10, %v423_v55  ;;  %v2876_v61 = vsel %vm354_vm1, %v420_v4, %v421_v10  ;;  %v430_v4 = vrot.slane %v2673_v8, 2 }
  0x84   : > { %593 = vrot.lane.b32.xlu0 %v2822_v18, %s2270_s29  ;;  %4281 = vst [vmem:[#allocation52_spill] sm:$0xff] %v2869_v21  ;;  %4283 = vst [vmem:[#allocation54_spill] sm:$0xff] %v2876_v61  ;;  %v2886_v55 = vsel %vm354_vm1, %v426_v63, %v428_v47  ;;  %v2893_v10 = vsel %vm354_vm1, %v425_v52, %v426_v63 }
  0x85   : > { %4285 = vst [vmem:[#allocation56_spill] sm:$0xff] %v2886_v55  ;;  %4287 = vst [vmem:[#allocation58_spill] sm:$0xff] %v2893_v10 }
  0x87   : > { %599 = vrot.lane.b32.xlu1 %v2830_v41, %s2270_s29 }
  0x88   : > { %597 = vrot.lane.b32.xlu0 %v2835_v35, %s2270_s29  ;;  %v3043_v35 = vld [vmem:[%s2354_s27 + $0x180] sm:$0xff] }
  0x89   : > { %4300 = vst [vmem:[#allocation71_spill] sm:$0xff] %v3043_v35 }
  0x8b   : > { %603 = vrot.lane.b32.xlu1 %v2843_v27, %s2270_s29 }
  0x8c   : > { %601 = vrot.lane.b32.xlu0 %v2848_v58, %s2270_s29 }
  0x8f   : > { %607 = vrot.lane.b32.xlu1 %v2856_v36, %s2270_s29 }
  0x90   : > { %605 = vrot.lane.b32.xlu0 %v2861_v29, %s2270_s29 }
  0x91   : > { %v2873_v6 = vpop.permute.xlu1 %465 }
  0x92   : > { %4282 = vst [vmem:[#allocation53_spill] sm:$0xff] %v2873_v6  ;;  %v2879_v9 = vpop.permute.xlu0 %461  ;;  %v433_v6 = vrot.slane %v2670_v44, 2  ;;  %v2908_v44 = vsel %vm354_vm1, %v430_v4, %v431_v45 }
  0x93   : > { %4284 = vst [vmem:[#allocation55_spill] sm:$0xff] %v2879_v9  ;;  %611 = vrot.lane.b32.xlu1 %v2869_v21, %s2270_s29  ;;  %4290 = vst [vmem:[#allocation61_spill] sm:$0xff] %v2908_v44 }
  0x94   : > { %609 = vrot.lane.b32.xlu0 %v2876_v61, %s2270_s29  ;;  %v2903_v47 = vsel %vm354_vm1, %v431_v45, %v433_v6 }
  0x95   : > { %v2890_v39 = vpop.permute.xlu1 %467  ;;  %4289 = vst [vmem:[#allocation60_spill] sm:$0xff] %v2903_v47 }
  0x96   : > { %4286 = vst [vmem:[#allocation57_spill] sm:$0xff] %v2890_v39  ;;  %v2896_v9 = vpop.permute.xlu0 %463 }
  0x97   : > { %4288 = vst [vmem:[#allocation59_spill] sm:$0xff] %v2896_v9  ;;  %615 = vrot.lane.b32.xlu1 %v2886_v55, %s2270_s29 }
  0x98   : > { %613 = vrot.lane.b32.xlu0 %v2893_v10, %s2270_s29 }
  0x99   : > { %v2905_v21 = vpop.permute.xlu1 %471 }
  0x9a   : > { %v2910_v63 = vpop.permute.xlu0 %469 }
  0x9b   : > { %619 = vrot.lane.b32.xlu1 %v2903_v47, %s2270_s29 }
  0x9c   : > { %617 = vrot.lane.b32.xlu0 %v2908_v44, %s2270_s29 }
  0x9d   : > { %v2916_v52 = vpop.permute.xlu1 %475 }
  0x9e   : > { %v2918_v39 = vpop.permute.xlu0 %473 }
  0x9f   : > { %655 = vrot.lane.b32.xlu1 %v2360_v1, %s2271_s30 }
  0xa0   : > { %653 = vrot.lane.b32.xlu0 %v2357_v0, %s2271_s30 }
  0xa1   : > { %v2924_v6 = vpop.permute.xlu1 %479 }
  0xa2   : > { %v2926_v45 = vpop.permute.xlu0 %477 }
  0xa3   : > { %659 = vrot.lane.b32.xlu1 %v2380_v11, %s2271_s30 }
  0xa4   : > { %657 = vrot.lane.b32.xlu0 %v2390_v15, %s2271_s30 }
  0xa5   : > { %v2932_v4 = vpop.permute.xlu1 %483 }
  0xa6   : > { %v2934_v47 = vpop.permute.xlu0 %481 }
  0xa7   : > { %663 = vrot.lane.b32.xlu1 %v2404_v22, %s2271_s30 }
  0xa8   : > { %661 = vrot.lane.b32.xlu0 %v2410_v24, %s2271_s30 }
  0xa9   : > { %v2940_v0 = vpop.permute.xlu1 %487 }
  0xaa   : > { %v2942_v1 = vpop.permute.xlu0 %485 }
  0xab   : > { %667 = vrot.lane.b32.xlu1 %v2425_v30, %s2271_s30 }
  0xac   : > { %665 = vrot.lane.b32.xlu0 %v2431_v32, %s2271_s30 }
  0xad   : > { %v2948_v44 = vpop.permute.xlu1 %491 }
  0xae   : > { %v2950_v55 = vpop.permute.xlu0 %489 }
  0xaf   : > { %671 = vrot.lane.b32.xlu1 %v2447_v38, %s2271_s30 }
  0xb0   : > { %669 = vrot.lane.b32.xlu0 %v2453_v40, %s2271_s30 }
  0xb1   : > { %v2956_v10 = vpop.permute.xlu1 %495 }
  0xb2   : > { %4291 = vst [vmem:[#allocation62_spill] sm:$0xff] %v2956_v10  ;;  %v2958_v9 = vpop.permute.xlu0 %493 }
  0xb3   : > { %4292 = vst [vmem:[#allocation63_spill] sm:$0xff] %v2958_v9  ;;  %675 = vrot.lane.b32.xlu1 %v2469_v46, %s2271_s30 }
  0xb4   : > { %673 = vrot.lane.b32.xlu0 %v2475_v48, %s2271_s30 }
  0xb5   : > { %v2964_v61 = vpop.permute.xlu1 %499 }
  0xb6   : > { %4293 = vst [vmem:[#allocation64_spill] sm:$0xff] %v2964_v61  ;;  %v2966_v57 = vpop.permute.xlu0 %497 }
  0xb7   : > { %4294 = vst [vmem:[#allocation65_spill] sm:$0xff] %v2966_v57  ;;  %679 = vrot.lane.b32.xlu1 %v2491_v54, %s2271_s30 }
  0xb8   : > { %677 = vrot.lane.b32.xlu0 %v2497_v56, %s2271_s30 }
  0xb9   : > { %v2972_v36 = vpop.permute.xlu1 %503 }
  0xba   : > { %v2974_v10 = vpop.permute.xlu0 %501 }
  0xbb   : > { %683 = vrot.lane.b32.xlu1 %v2513_v62, %s2271_s30 }
  0xbc   : > { %681 = vrot.lane.b32.xlu0 %v2519_v3, %s2271_s30 }
  0xbd   : > { %v2980_v9 = vpop.permute.xlu1 %507 }
  0xbe   : > { %v2982_v61 = vpop.permute.xlu0 %505 }
  0xbf   : > { %687 = vrot.lane.b32.xlu1 %v2535_v16, %s2271_s30 }
  0xc0   : > { %685 = vrot.lane.b32.xlu0 %v2541_v19, %s2271_s30 }
  0xc1   : > { %v2988_v57 = vpop.permute.xlu1 %511 }
  0xc2   : > { %v2990_v29 = vpop.permute.xlu0 %509 }
  0xc3   : > { %691 = vrot.lane.b32.xlu1 %v2557_v34, %s2271_s30 }
  0xc4   : > { %689 = vrot.lane.b32.xlu0 %v2563_v37, %s2271_s30 }
  0xc5   : > { %v2996_v62 = vpop.permute.xlu1 %515 }
  0xc6   : > { %v2998_v3 = vpop.permute.xlu0 %513 }
  0xc7   : > { %695 = vrot.lane.b32.xlu1 %v2579_v53, %s2271_s30 }
  0xc8   : > { %693 = vrot.lane.b32.xlu0 %v2585_v59, %s2271_s30 }
  0xc9   : > { %v3004_v16 = vpop.permute.xlu1 %519 }
  0xca   : > { %v3006_v19 = vpop.permute.xlu0 %517 }
  0xcb   : > { %699 = vrot.lane.b32.xlu1 %v2601_v26, %s2271_s30 }
  0xcc   : > { %697 = vrot.lane.b32.xlu0 %v2607_v50, %s2271_s30 }
  0xcd   : > { %v3012_v31 = vpop.permute.xlu1 %523 }
  0xce   : > { %v3014_v5 = vpop.permute.xlu0 %521 }
  0xcf   : > { %703 = vrot.lane.b32.xlu1 %v2623_v20, %s2271_s30 }
  0xd0   : > { %701 = vrot.lane.b32.xlu0 %v2629_v13, %s2271_s30 }
  0xd1   : > { %v3020_v27 = vpop.permute.xlu1 %559 }
  0xd2   : > { %4295 = vst [vmem:[#allocation66_spill] sm:$0xff] %v3020_v27  ;;  %v3022_v58 = vpop.permute.xlu0 %557  ;;  %v3037_v27 = vld [vmem:[%s2354_s27 + $0x188] sm:$0xff] }
  0xd3   : > { %4296 = vst [vmem:[#allocation67_spill] sm:$0xff] %v3022_v58  ;;  %707 = vrot.lane.b32.xlu1 %v2645_v60, %s2271_s30  ;;  %4299 = vst [vmem:[#allocation70_spill] sm:$0xff] %v3037_v27  ;;  %v1235_v58 = vsel %vm1229_vm2, %v2380_v11, %v2905_v21  ;;  %v1237_v21 = vsel %vm1229_vm2, %v2404_v22, %v2916_v52 }
  0xd4   : > { %705 = vrot.lane.b32.xlu0 %v2651_v42, %s2271_s30 }
  0xd5   : > { %v3028_v23 = vpop.permute.xlu1 %563 }
  0xd6   : > { %4297 = vst [vmem:[#allocation68_spill] sm:$0xff] %v3028_v23  ;;  %v3030_v43 = vpop.permute.xlu0 %561  ;;  %v1234_v23 = vsel %vm1229_vm2, %v2390_v15, %v2910_v63  ;;  %v1239_v63 = vsel %vm1229_vm2, %v2425_v30, %v2924_v6  ;;  %v1240_v30 = vsel %vm1229_vm2, %v2453_v40, %v2934_v47  ;;  %v1242_v40 = vsel %vm1229_vm2, %v2475_v48, %v2942_v1 }
  0xd7   : > { %4298 = vst [vmem:[#allocation69_spill] sm:$0xff] %v3030_v43  ;;  %711 = vrot.lane.b32.xlu1 %v2667_v49, %s2271_s30  ;;  %v1244_v48 = vsel %vm1229_vm2, %v2497_v56, %v2950_v55  ;;  %v4307_v56 = vld [vmem:[#allocation12_spill] sm:$0xff] }
  0xd8   : > { %709 = vrot.lane.b32.xlu0 %v2673_v8, %s2271_s30 }
  0xd9   : > { %v568_v41 = vpop.permute.xlu1 %567 }
  0xda   : > { %v3049_v43 = vsel %vm1262_vm3, %v1235_v58, %v568_v41  ;;  %v566_v14 = vpop.permute.xlu0 %565  ;;  %v1236_v41 = vsel %vm1229_vm2, %v2410_v24, %v2918_v39 }
  0xdb   : > { %v3052_v8 = vsel %vm1262_vm3, %v1234_v23, %v566_v14  ;;  %715 = vrot.lane.b32.xlu1 %v3037_v27, %s2271_s30 }
  0xdc   : > { %713 = vrot.lane.b32.xlu0 %v3043_v35, %s2271_s30 }
  0xdd   : > { %v572_v11 = vpop.permute.xlu1 %571 }
  0xde   : > { %v3065_v58 = vsel %vm1262_vm3, %v1237_v21, %v572_v11  ;;  %v570_v14 = vpop.permute.xlu0 %569  ;;  %v1238_v11 = vsel %vm1229_vm2, %v2431_v32, %v2926_v45 }
  0xdf   : > { %v3068_v23 = vsel %vm1262_vm3, %v1236_v41, %v570_v14  ;;  %751 = vrot.lane.b32.xlu1 %v2397_v17, %s2272_s3  ;;  %v4301_v14 = vld [vmem:[#allocation6_spill] sm:$0xff] }
  0xe0   : > { %749 = vrot.lane.b32.xlu0 %v2383_v12, %s2272_s3  ;;  %v1241_v12 = vsel %vm1229_vm2, %v2447_v38, %v2932_v4  ;;  %v1243_v38 = vsel %vm1229_vm2, %v2469_v46, %v2940_v0  ;;  %v1245_v46 = vsel %vm1229_vm2, %v2491_v54, %v2948_v44  ;;  %v4306_v44 = vld [vmem:[#allocation11_spill] sm:$0xff] }
  0xe1   : > { %v576_v52 = vpop.permute.xlu1 %575 }
  0xe2   : > { %v3081_v39 = vsel %vm1262_vm3, %v1239_v63, %v576_v52  ;;  %v574_v21 = vpop.permute.xlu0 %573 }
  0xe3   : > { %v3084_v41 = vsel %vm1262_vm3, %v1238_v11, %v574_v21  ;;  %755 = vrot.lane.b32.xlu1 %v2416_v25, %s2272_s3  ;;  %v4302_v11 = vld [vmem:[#allocation7_spill] sm:$0xff]  ;;  %v4303_v21 = vld [vmem:[#allocation8_spill] sm:$0xff] }
  0xe4   : > { %753 = vrot.lane.b32.xlu0 %v2421_v28, %s2272_s3 }
  0xe5   : > { %v580_v17 = vpop.permute.xlu1 %579 }
  0xe6   : > { %v3097_v32 = vsel %vm1262_vm3, %v1241_v12, %v580_v17  ;;  %v578_v6 = vpop.permute.xlu0 %577 }
  0xe7   : > { %v3100_v45 = vsel %vm1262_vm3, %v1240_v30, %v578_v6  ;;  %759 = vrot.lane.b32.xlu1 %v2438_v33, %s2272_s3  ;;  %v4304_v30 = vld [vmem:[#allocation9_spill] sm:$0xff]  ;;  %v4305_v6 = vld [vmem:[#allocation10_spill] sm:$0xff] }
  0xe8   : > { %757 = vrot.lane.b32.xlu0 %v4301_v14, %s2272_s3 }
  0xe9   : > { %v584_v4 = vpop.permute.xlu1 %583 }
  0xea   : > { %v3113_v47 = vsel %vm1262_vm3, %v1243_v38, %v584_v4  ;;  %v582_v63 = vpop.permute.xlu0 %581 }
  0xeb   : > { %v3116_v52 = vsel %vm1262_vm3, %v1242_v40, %v582_v63  ;;  %763 = vrot.lane.b32.xlu1 %v4302_v11, %s2272_s3  ;;  %v4309_v40 = vld [vmem:[#allocation13_spill] sm:$0xff]  ;;  %v4310_v63 = vld [vmem:[#allocation14_spill] sm:$0xff] }
  0xec   : > { %761 = vrot.lane.b32.xlu0 %v4303_v21, %s2272_s3 }
  0xed   : > { %v588_v0 = vpop.permute.xlu1 %587 }
  0xee   : > { %v3129_v1 = vsel %vm1262_vm3, %v1245_v46, %v588_v0  ;;  %v586_v12 = vpop.permute.xlu0 %585  ;;  %v1251_v46 = vsel %vm1229_vm2, %v2557_v34, %v2972_v36  ;;  %v1253_v36 = vsel %vm1229_vm2, %v2579_v53, %v2980_v9  ;;  %v1255_v9 = vsel %vm1229_vm2, %v2601_v26, %v2988_v57 }
  0xef   : > { %v3132_v17 = vsel %vm1262_vm3, %v1244_v48, %v586_v12  ;;  %767 = vrot.lane.b32.xlu1 %v4304_v30, %s2272_s3  ;;  %v1250_v48 = vsel %vm1229_vm2, %v2563_v37, %v2974_v10  ;;  %v1252_v10 = vsel %vm1229_vm2, %v2585_v59, %v2982_v61  ;;  %v1254_v61 = vsel %vm1229_vm2, %v2607_v50, %v2990_v29 }
  0xf0   : > { %765 = vrot.lane.b32.xlu0 %v4305_v6, %s2272_s3  ;;  %v1257_v57 = vsel %vm1229_vm2, %v2623_v20, %v2996_v62  ;;  %v1256_v29 = vsel %vm1229_vm2, %v2629_v13, %v2998_v3  ;;  %v1258_v3 = vsel %vm1229_vm2, %v2651_v42, %v3006_v19  ;;  %v4315_v42 = vld [vmem:[#allocation27_spill] sm:$0xff] }
  0xf1   : > { %v3138_v38 = vpop.permute.xlu1 %591 }
  0xf2   : > { %v3140_v54 = vpop.permute.xlu0 %589 }
  0xf3   : > { %771 = vrot.lane.b32.xlu1 %v4306_v44, %s2272_s3 }
  0xf4   : > { %769 = vrot.lane.b32.xlu0 %v4307_v56, %s2272_s3 }
  0xf5   : > { %v3146_v55 = vpop.permute.xlu1 %595 }
  0xf6   : > { %4308 = vst [vmem:[#allocation6_spill] sm:$0xff] %v3146_v55  ;;  %v3148_v4 = vpop.permute.xlu0 %593 }
  0xf7   : > { %775 = vrot.lane.b32.xlu1 %v4309_v40, %s2272_s3  ;;  %v4311_v40 = vld [vmem:[#allocation15_spill] sm:$0xff] }
  0xf8   : > { %773 = vrot.lane.b32.xlu0 %v4310_v63, %s2272_s3  ;;  %v4312_v63 = vld [vmem:[#allocation16_spill] sm:$0xff] }
  0xf9   : > { %v600_v0 = vpop.permute.xlu1 %599 }
  0xfa   : > { %v3161_v12 = vsel %vm1262_vm3, %v1251_v46, %v600_v0  ;;  %v598_v27 = vpop.permute.xlu0 %597 }
  0xfb   : > { %v3164_v35 = vsel %vm1262_vm3, %v1250_v48, %v598_v27  ;;  %779 = vrot.lane.b32.xlu1 %v4311_v40, %s2272_s3  ;;  %v4313_v48 = vld [vmem:[#allocation17_spill] sm:$0xff]  ;;  %v4314_v40 = vld [vmem:[#allocation18_spill] sm:$0xff] }
  0xfc   : > { %777 = vrot.lane.b32.xlu0 %v4312_v63, %s2272_s3 }
  0xfd   : > { %v604_v55 = vpop.permute.xlu1 %603 }
  0xfe   : > { %v3177_v46 = vsel %vm1262_vm3, %v1253_v36, %v604_v55  ;;  %v602_v27 = vpop.permute.xlu0 %601 }
  0xff   : > { %v3180_v0 = vsel %vm1262_vm3, %v1252_v10, %v602_v27  ;;  %783 = vrot.lane.b32.xlu1 %v4313_v48, %s2272_s3 }
 0x100   : > { %781 = vrot.lane.b32.xlu0 %v4314_v40, %s2272_s3 }
 0x101   : > { %v608_v63 = vpop.permute.xlu1 %607 }
 0x102   : > { %v3193_v55 = vsel %vm1262_vm3, %v1255_v9, %v608_v63  ;;  %v606_v36 = vpop.permute.xlu0 %605 }
 0x103   : > { %v3196_v10 = vsel %vm1262_vm3, %v1254_v61, %v606_v36  ;;  %877 = vrot.lane.b32.xlu1 %v2822_v18, %s2273_s4 }
 0x104   : > { %845 = vrot.lane.b32.xlu0 %v2718_v51, %s2273_s4  ;;  %v1259_v51 = vsel %vm1229_vm2, %v2645_v60, %v3004_v16  ;;  %v1261_v60 = vsel %vm1229_vm2, %v2667_v49, %v3012_v31  ;;  %v1260_v16 = vsel %vm1229_vm2, %v4315_v42, %v3014_v5  ;;  %v1497_v49 = vld [vmem:[%s4122_s1 + $0x20] sm:$0xf]  ;;  %v4317_v31 = vld [vmem:[#allocation20_spill] sm:$0xff] }
 0x105   : > { %v612_v27 = vpop.permute.xlu1 %611  ;;  %2038 = vmatprep.subr.msk.mxu0 %vm1595_vm4, %v1497_v49  ;;  %2096 = vmatprep.subr.msk.mxu1 %vm1595_vm4, %v1497_v49 }
 0x106   : > { %v3209_v63 = vsel %vm1262_vm3, %v1257_v57, %v612_v27  ;;  %v610_v9 = vpop.permute.xlu0 %609  ;;  %2039 = vmatpush3.msk.msra.mxu0 %vm1595_vm4, %v1497_v49  ;;  %2101 = vmatpush3.msk.msra.mxu1 %vm1595_vm4, %v1497_v49 }
 0x107   : > { %v3212_v61 = vsel %vm1262_vm3, %v1256_v29, %v610_v9  ;;  %879 = vrot.lane.b32.xlu1 %v2817_v7, %s2273_s4 }
 0x108   : > { %847 = vrot.lane.b32.xlu0 %v2713_v2, %s2273_s4 }
 0x109   : > { %v616_v62 = vpop.permute.xlu1 %615 }
 0x10a   : > { %v3225_v36 = vsel %vm1262_vm3, %v1259_v51, %v616_v62  ;;  %v614_v57 = vpop.permute.xlu0 %613  ;;  %v1495_v51 = vld [vmem:[%s4122_s1 + $0x10] sm:$0xff] }
 0x10b   : > { %v3228_v27 = vsel %vm1262_vm3, %v1258_v3, %v614_v57  ;;  %973 = vrot.lane.b32.xlu1 %v2563_v37, %s2274_s5  ;;  %v1493_v57 = vld [vmem:[%s4122_s1] sm:$0xff] }
 0x10c   : > { %941 = vrot.lane.b32.xlu0 %v2390_v15, %s2274_s5  ;;  %v4316_v15 = vld [vmem:[#allocation5_spill] sm:$0xff] }
 0x10d   : > { %v620_v2 = vpop.permute.xlu1 %619 }
 0x10e   : > { %v3241_v19 = vsel %vm1262_vm3, %v1261_v60, %v620_v2  ;;  %v618_v29 = vpop.permute.xlu0 %617 }
 0x10f   : > { %v3244_v9 = vsel %vm1262_vm3, %v1260_v16, %v618_v29  ;;  %975 = vrot.lane.b32.xlu1 %v2557_v34, %s2274_s5  ;;  %v1496_v34 = vld [vmem:[%s4122_s1 + $0x18] sm:$0xff]  ;;  %v4318_v16 = vld [vmem:[#allocation33_spill] sm:$0xff]  ;;  %v4319_v29 = vld [vmem:[#allocation19_spill] sm:$0xff] }
 0x110   : > { %943 = vrot.lane.b32.xlu0 %v4316_v15, %s2274_s5  ;;  %2040 = vmatprep.subr.mxu0 %v1496_v34 }
 0x111   : > { %v3253_v37 = vpop.permute.xlu1 %655  ;;  %2097 = vmatprep.subr.mxu1 %v1496_v34  ;;  %2041 = vmatpush3.msra.mxu0 %v1496_v34 }
 0x112   : > { %v3255_v5 = vpop.permute.xlu0 %653  ;;  %2102 = vmatpush3.msra.mxu1 %v1496_v34  ;;  %2042 = vmatprep.subr.mxu0 %v1495_v51  ;;  %v4320_v34 = vld [vmem:[#allocation47_spill] sm:$0xff] }
 0x113   : > { %1069 = vrot.lane.b32.xlu1 %v4317_v31, %s2275_s16  ;;  %2098 = vmatprep.subr.mxu1 %v1495_v51 }
 0x114   : > { %1037 = vrot.lane.b32.xlu0 %v2421_v28, %s2275_s16  ;;  %2043 = vmatpush3.msra.mxu0 %v1495_v51  ;;  %v1494_v28 = vld [vmem:[%s4122_s1 + $0x8] sm:$0xff] }
 0x115   : > { %v3267_v62 = vpop.permute.xlu1 %659  ;;  %2103 = vmatpush3.msra.mxu1 %v1495_v51  ;;  %2044 = vmatprep.subr.mxu0 %v1494_v28 }
 0x116   : > { %v3269_v3 = vpop.permute.xlu0 %657  ;;  %2099 = vmatprep.subr.mxu1 %v1494_v28  ;;  %2045 = vmatpush3.msra.mxu0 %v1494_v28 }
 0x117   : > { %1039 = vrot.lane.b32.xlu1 %v2416_v25, %s2275_s16  ;;  %2104 = vmatpush3.msra.mxu1 %v1494_v28 }
 0x118   : > { %785 = vrot.lane.b32.xlu0 %v4317_v31, %s2272_s3  ;;  %2046 = vmatprep.subr.mxu0 %v1493_v57 }
 0x119   : > { %v664_v60 = vpop.permute.xlu1 %663  ;;  %2100 = vmatprep.subr.mxu1 %v1493_v57  ;;  %2047 = vmatpush3.msra.mxu0 %v1493_v57 }
 0x11a   : > { %v3283_v25 = vsel %vm1295_vm5, %v3049_v43, %v664_v60  ;;  %v662_v2 = vpop.permute.xlu0 %661  ;;  %2105 = vmatpush3.msra.mxu1 %v1493_v57 }
 0x11b   : > { %v3287_v42 = vsel %vm1295_vm5, %v3052_v8, %v662_v2  ;;  %1133 = vrot.lane.b32.xlu1 %v4318_v16, %s2276_s28  ;;  %v4322_v2 = vld [vmem:[#allocation46_spill] sm:$0xff] }
 0x11c   : > { %1071 = vrot.lane.b32.xlu0 %v4319_v29, %s2275_s16 }
 0x11d   : > { %v668_v15 = vpop.permute.xlu1 %667 }
 0x11e   : > { %v3295_v43 = vsel %vm1295_vm5, %v3065_v58, %v668_v15  ;;  %v666_v49 = vpop.permute.xlu0 %665 }
 0x11f   : > { %v3299_v8 = vsel %vm1295_vm5, %v3068_v23, %v666_v49  ;;  %787 = vrot.lane.b32.xlu1 %v4319_v29, %s2272_s3 }
 0x120   : > { %1165 = vrot.lane.b32.xlu0 %v4320_v34, %s2276_s28 }
 0x121   : > { %v672_v31 = vpop.permute.xlu1 %671 }
 0x122   : > { %v3307_v51 = vsel %vm1295_vm5, %v3081_v39, %v672_v31  ;;  %v670_v28 = vpop.permute.xlu0 %669 }
 0x123   : > { %v3311_v58 = vsel %vm1295_vm5, %v3084_v41, %v670_v28  ;;  %881 = vrot.lane.b32.xlu1 %v4320_v34, %s2273_s4  ;;  %v4323_v41 = vld [vmem:[#allocation32_spill] sm:$0xff]  ;;  %v4328_v28 = vld [vmem:[#allocation22_spill] sm:$0xff] }
 0x124   : > { %849 = vrot.lane.b32.xlu0 %v4318_v16, %s2273_s4 }
 0x125   : > { %v676_v23 = vpop.permute.xlu1 %675 }
 0x126   : > { %v3319_v57 = vsel %vm1295_vm5, %v3097_v32, %v676_v23  ;;  %v674_v60 = vpop.permute.xlu0 %673 }
 0x127   : > { %4321 = vst [vmem:[#allocation7_spill] sm:$0xff] %v3319_v57  ;;  %v3323_v39 = vsel %vm1295_vm5, %v3100_v45, %v674_v60  ;;  %1167 = vrot.lane.b32.xlu1 %v4322_v2, %s2276_s28 }
 0x128   : > { %1135 = vrot.lane.b32.xlu0 %v4323_v41, %s2276_s28 }
 0x129   : > { %v680_v29 = vpop.permute.xlu1 %679 }
 0x12a   : > { %v3331_v16 = vsel %vm1295_vm5, %v3113_v47, %v680_v29  ;;  %v678_v15 = vpop.permute.xlu0 %677 }
 0x12b   : > { %4324 = vst [vmem:[#allocation8_spill] sm:$0xff] %v3331_v16  ;;  %v3335_v32 = vsel %vm1295_vm5, %v3116_v52, %v678_v15  ;;  %883 = vrot.lane.b32.xlu1 %v4322_v2, %s2273_s4  ;;  %v4329_v2 = vld [vmem:[#allocation35_spill] sm:$0xff] }
 0x12c   : > { %4325 = vst [vmem:[#allocation9_spill] sm:$0xff] %v3335_v32  ;;  %851 = vrot.lane.b32.xlu0 %v4323_v41, %s2273_s4 }
 0x12d   : > { %v684_v45 = vpop.permute.xlu1 %683 }
 0x12e   : > { %v3343_v49 = vsel %vm1295_vm5, %v3129_v1, %v684_v45  ;;  %v682_v34 = vpop.permute.xlu0 %681 }
 0x12f   : > { %4326 = vst [vmem:[#allocation10_spill] sm:$0xff] %v3343_v49  ;;  %v3347_v47 = vsel %vm1295_vm5, %v3132_v17, %v682_v34  ;;  %977 = vrot.lane.b32.xlu1 %v2585_v59, %s2274_s5  ;;  %v4350_v49 = vld [vmem:[#allocation36_spill] sm:$0xff] }
 0x130   : > { %4327 = vst [vmem:[#allocation11_spill] sm:$0xff] %v3347_v47  ;;  %945 = vrot.lane.b32.xlu0 %v2410_v24, %s2274_s5 }
 0x131   : > { %v3353_v52 = vpop.permute.xlu1 %687 }
 0x132   : > { %v3355_v31 = vpop.permute.xlu0 %685 }
 0x133   : > { %979 = vrot.lane.b32.xlu1 %v2579_v53, %s2274_s5 }
 0x134   : > { %947 = vrot.lane.b32.xlu0 %v2404_v22, %s2274_s5 }
 0x135   : > { %v3361_v1 = vpop.permute.xlu1 %691 }
 0x136   : > { %v3363_v17 = vpop.permute.xlu0 %689 }
 0x137   : > { %1073 = vrot.lane.b32.xlu1 %v4328_v28, %s2275_s16 }
 0x138   : > { %1041 = vrot.lane.b32.xlu0 %v4301_v14, %s2275_s16 }
 0x139   : > { %v696_v24 = vpop.permute.xlu1 %695 }
 0x13a   : > { %v3371_v59 = vsel %vm1295_vm5, %v3161_v12, %v696_v24  ;;  %v694_v23 = vpop.permute.xlu0 %693 }
 0x13b   : > { %v3375_v53 = vsel %vm1295_vm5, %v3164_v35, %v694_v23  ;;  %1043 = vrot.lane.b32.xlu1 %v2438_v33, %s2275_s16  ;;  %v4330_v35 = vld [vmem:[#allocation21_spill] sm:$0xff]  ;;  %v4337_v23 = vld [vmem:[#allocation34_spill] sm:$0xff] }
 0x13c   : > { %789 = vrot.lane.b32.xlu0 %v4328_v28, %s2272_s3 }
 0x13d   : > { %v700_v22 = vpop.permute.xlu1 %699 }
 0x13e   : > { %v3383_v14 = vsel %vm1295_vm5, %v3177_v46, %v700_v22  ;;  %v698_v60 = vpop.permute.xlu0 %697 }
 0x13f   : > { %v3387_v12 = vsel %vm1295_vm5, %v3180_v0, %v698_v60  ;;  %1137 = vrot.lane.b32.xlu1 %v4329_v2, %s2276_s28  ;;  %v4331_v0 = vld [vmem:[#allocation49_spill] sm:$0xff] }
 0x140   : > { %1075 = vrot.lane.b32.xlu0 %v4330_v35, %s2275_s16 }
 0x141   : > { %v704_v33 = vpop.permute.xlu1 %703 }
 0x142   : > { %v3395_v41 = vsel %vm1295_vm5, %v3193_v55, %v704_v33  ;;  %v702_v29 = vpop.permute.xlu0 %701 }
 0x143   : > { %v3399_v46 = vsel %vm1295_vm5, %v3196_v10, %v702_v29  ;;  %791 = vrot.lane.b32.xlu1 %v4330_v35, %s2272_s3  ;;  %v2172_v29 = vld [vmem:[%s2354_s27 + $0x68] sm:$0xff] }
 0x144   : > { %1169 = vrot.lane.b32.xlu0 %v4331_v0, %s2276_s28 }
 0x145   : > { %v708_v15 = vpop.permute.xlu1 %707 }
 0x146   : > { %v3407_v45 = vsel %vm1295_vm5, %v3209_v63, %v708_v15  ;;  %v706_v34 = vpop.permute.xlu0 %705 }
 0x147   : > { %4332 = vst [vmem:[#allocation12_spill] sm:$0xff] %v3407_v45  ;;  %v3411_v55 = vsel %vm1295_vm5, %v3212_v61, %v706_v34  ;;  %885 = vrot.lane.b32.xlu1 %v4331_v0, %s2273_s4  ;;  %v4336_v61 = vld [vmem:[#allocation48_spill] sm:$0xff] }
 0x148   : > { %4333 = vst [vmem:[#allocation17_spill] sm:$0xff] %v3411_v55  ;;  %853 = vrot.lane.b32.xlu0 %v4329_v2, %s2273_s4  ;;  %v4340_v34 = vld [vmem:[#allocation24_spill] sm:$0xff]  ;;  %v4357_v55 = vld [vmem:[#allocation54_spill] sm:$0xff] }
 0x149   : > { %v712_v10 = vpop.permute.xlu1 %711 }
 0x14a   : > { %v3419_v28 = vsel %vm1295_vm5, %v3225_v36, %v712_v10  ;;  %v710_v24 = vpop.permute.xlu0 %709 }
 0x14b   : > { %4334 = vst [vmem:[#allocation18_spill] sm:$0xff] %v3419_v28  ;;  %v3423_v63 = vsel %vm1295_vm5, %v3228_v27, %v710_v24  ;;  %1171 = vrot.lane.b32.xlu1 %v4336_v61, %s2276_s28 }
 0x14c   : > { %4335 = vst [vmem:[#allocation27_spill] sm:$0xff] %v3423_v63  ;;  %1139 = vrot.lane.b32.xlu0 %v4337_v23, %s2276_s28  ;;  %v4352_v63 = vld [vmem:[#allocation55_spill] sm:$0xff] }
 0x14d   : > { %v716_v22 = vpop.permute.xlu1 %715 }
 0x14e   : > { %v3431_v60 = vsel %vm1295_vm5, %v3241_v19, %v716_v22  ;;  %v714_v2 = vpop.permute.xlu0 %713  ;;  %v2171_v19 = vld [vmem:[%s2354_s27 + $0x60] sm:$0xff] }
 0x14f   : > { %4338 = vst [vmem:[#allocation5_spill] sm:$0xff] %v3431_v60  ;;  %v3435_v36 = vsel %vm1295_vm5, %v3244_v9, %v714_v2  ;;  %887 = vrot.lane.b32.xlu1 %v4336_v61, %s2273_s4  ;;  %v4341_v61 = vld [vmem:[#allocation37_spill] sm:$0xff] }
 0x150   : > { %4339 = vst [vmem:[#allocation20_spill] sm:$0xff] %v3435_v36  ;;  %855 = vrot.lane.b32.xlu0 %v4337_v23, %s2273_s4  ;;  %v4342_v23 = vld [vmem:[#allocation23_spill] sm:$0xff] }
 0x151   : > { %v3441_v27 = vpop.permute.xlu1 %751 }
 0x152   : > { %v3443_v35 = vpop.permute.xlu0 %749 }
 0x153   : > { %981 = vrot.lane.b32.xlu1 %v2607_v50, %s2274_s5 }
 0x154   : > { %949 = vrot.lane.b32.xlu0 %v2171_v19, %s2274_s5 }
 0x155   : > { %v3449_v33 = vpop.permute.xlu1 %755 }
 0x156   : > { %v3451_v9 = vpop.permute.xlu0 %753 }
 0x157   : > { %983 = vrot.lane.b32.xlu1 %v2601_v26, %s2274_s5 }
 0x158   : > { %951 = vrot.lane.b32.xlu0 %v2172_v29, %s2274_s5 }
 0x159   : > { %v3457_v0 = vpop.permute.xlu1 %759 }
 0x15a   : > { %v3459_v15 = vpop.permute.xlu0 %757 }
 0x15b   : > { %1077 = vrot.lane.b32.xlu1 %v4340_v34, %s2275_s16 }
 0x15c   : > { %1045 = vrot.lane.b32.xlu0 %v4303_v21, %s2275_s16 }
 0x15d   : > { %v3465_v50 = vpop.permute.xlu1 %763 }
 0x15e   : > { %v3467_v10 = vpop.permute.xlu0 %761 }
 0x15f   : > { %1047 = vrot.lane.b32.xlu1 %v4302_v11, %s2275_s16  ;;  %v4344_v11 = vld [vmem:[#allocation51_spill] sm:$0xff] }
 0x160   : > { %793 = vrot.lane.b32.xlu0 %v4340_v34, %s2272_s3 }
 0x161   : > { %v3473_v26 = vpop.permute.xlu1 %767 }
 0x162   : > { %v3475_v24 = vpop.permute.xlu0 %765 }
 0x163   : > { %1141 = vrot.lane.b32.xlu1 %v4341_v61, %s2276_s28 }
 0x164   : > { %1079 = vrot.lane.b32.xlu0 %v4342_v23, %s2275_s16 }
 0x165   : > { %v3481_v21 = vpop.permute.xlu1 %771 }
 0x166   : > { %4343 = vst [vmem:[#allocation33_spill] sm:$0xff] %v3481_v21  ;;  %v3483_v22 = vpop.permute.xlu0 %769 }
 0x167   : > { %795 = vrot.lane.b32.xlu1 %v4342_v23, %s2272_s3  ;;  %v4349_v23 = vld [vmem:[#allocation50_spill] sm:$0xff] }
 0x168   : > { %1173 = vrot.lane.b32.xlu0 %v4344_v11, %s2276_s28 }
 0x169   : > { %v3489_v2 = vpop.permute.xlu1 %775 }
 0x16a   : > { %4345 = vst [vmem:[#allocation19_spill] sm:$0xff] %v3489_v2  ;;  %v3491_v19 = vpop.permute.xlu0 %773  ;;  %v4351_v2 = vld [vmem:[#allocation26_spill] sm:$0xff] }
 0x16b   : > { %4346 = vst [vmem:[#allocation47_spill] sm:$0xff] %v3491_v19  ;;  %889 = vrot.lane.b32.xlu1 %v4344_v11, %s2273_s4  ;;  %v4353_v19 = vld [vmem:[#allocation39_spill] sm:$0xff] }
 0x16c   : > { %857 = vrot.lane.b32.xlu0 %v4341_v61, %s2273_s4 }
 0x16d   : > { %v3497_v29 = vpop.permute.xlu1 %779 }
 0x16e   : > { %4347 = vst [vmem:[#allocation46_spill] sm:$0xff] %v3497_v29  ;;  %v3499_v34 = vpop.permute.xlu0 %777  ;;  %v2173_v29 = vld [vmem:[%s2354_s27 + $0x78] sm:$0xff] }
 0x16f   : > { %4348 = vst [vmem:[#allocation32_spill] sm:$0xff] %v3499_v34  ;;  %1175 = vrot.lane.b32.xlu1 %v4349_v23, %s2276_s28 }
 0x170   : > { %1143 = vrot.lane.b32.xlu0 %v4350_v49, %s2276_s28 }
 0x171   : > { %v3505_v60 = vpop.permute.xlu1 %783 }
 0x172   : > { %v782_v47 = vpop.permute.xlu0 %781 }
 0x173   : > { %891 = vrot.lane.b32.xlu1 %v4349_v23, %s2273_s4  ;;  %v2174_v23 = vld [vmem:[%s2354_s27 + $0x80] sm:$0xff] }
 0x174   : > { %859 = vrot.lane.b32.xlu0 %v4350_v49, %s2273_s4 }
 0x175   : > { %v878_v61 = vpop.permute.xlu1 %877 }
 0x176   : > { %v846_v11 = vpop.permute.xlu0 %845 }
 0x177   : > { %985 = vrot.lane.b32.xlu1 %v2629_v13, %s2274_s5 }
 0x178   : > { %953 = vrot.lane.b32.xlu0 %v2173_v29, %s2274_s5 }
 0x179   : > { %v3515_v34 = vpop.permute.xlu1 %879 }
 0x17a   : > { %v3517_v36 = vpop.permute.xlu0 %847 }
 0x17b   : > { %987 = vrot.lane.b32.xlu1 %v2623_v20, %s2274_s5 }
 0x17c   : > { %955 = vrot.lane.b32.xlu0 %v2174_v23, %s2274_s5  ;;  %v2175_v23 = vld [vmem:[%s2354_s27] sm:$0xff] }
 0x17d   : > { %v974_v49 = vpop.permute.xlu1 %973  ;;  %v1230_v32 = vsel %vm1229_vm2, %v2175_v23, %v4352_v63 }
 0x17e   : > { %v942_v16 = vpop.permute.xlu0 %941 }
 0x17f   : > { %1081 = vrot.lane.b32.xlu1 %v4351_v2, %s2275_s16 }
 0x180   : > { %1049 = vrot.lane.b32.xlu0 %v4305_v6, %s2275_s16  ;;  %v4354_v6 = vld [vmem:[#allocation67_spill] sm:$0xff] }
 0x181   : > { %v976_v13 = vpop.permute.xlu1 %975  ;;  %v1263_v57 = vsel %vm1262_vm3, %v1230_v32, %v4354_v6  ;;  %v3552_v32 = vld [vmem:[%s2354_s27 + $0xc0] sm:$0xff]  ;;  %v4356_v6 = vld [vmem:[#allocation63_spill] sm:$0xff] }
 0x182   : > { %v3527_v29 = vpop.permute.xlu0 %943 }
 0x183   : > { %1051 = vrot.lane.b32.xlu1 %v4304_v30, %s2275_s16  ;;  %v4355_v30 = vld [vmem:[#allocation25_spill] sm:$0xff] }
 0x184   : > { %797 = vrot.lane.b32.xlu0 %v4351_v2, %s2272_s3  ;;  %v1296_v2 = vsel %vm1295_vm5, %v1263_v57, %v3255_v5  ;;  %v1246_v5 = vsel %vm1229_vm2, %v3552_v32, %v4356_v6 }
 0x185   : > { %v1070_v20 = vpop.permute.xlu1 %1069  ;;  %v1329_v45 = vsel %vm1328_vm6, %v1296_v2, %v3443_v35 }
 0x186   : > { %v1038_v28 = vpop.permute.xlu0 %1037  ;;  %v1362_v23 = vsel %vm1361_vm7, %v1329_v45, %v846_v11  ;;  %v1279_v45 = vsel %vm1262_vm3, %v1246_v5, %v3140_v54 }
 0x187   : > { %1145 = vrot.lane.b32.xlu1 %v4353_v19, %s2276_s28  ;;  %v1395_v57 = vsel %vm1394_vm8, %v1362_v23, %v942_v16 }
 0x188   : > { %1083 = vrot.lane.b32.xlu0 %v4355_v30, %s2275_s16  ;;  %v1428_v35 = vsel %vm1427_vm9, %v1395_v57, %v1038_v28  ;;  %v3578_v57 = vld [vmem:[%s2354_s27 + $0xc8] sm:$0xff] }
 0x189   : > { %v1040_v21 = vpop.permute.xlu1 %1039 }
 0x18a   : > { %v3546_v63 = vpop.permute.xlu0 %785 }
 0x18b   : > { %799 = vrot.lane.b32.xlu1 %v4355_v30, %s2272_s3  ;;  %v1312_v30 = vsel %vm1295_vm5, %v1279_v45, %v3355_v31  ;;  %v4359_v45 = vld [vmem:[#allocation52_spill] sm:$0xff] }
 0x18c   : > { %1177 = vrot.lane.b32.xlu0 %v4357_v55, %s2276_s28  ;;  %v1345_v16 = vsel %vm1328_vm6, %v1312_v30, %v782_v47  ;;  %v4358_v47 = vld [vmem:[#allocation62_spill] sm:$0xff] }
 0x18d   : > { %v1134_v11 = vpop.permute.xlu1 %1133  ;;  %v1378_v23 = vsel %vm1361_vm7, %v1345_v16, %v878_v61  ;;  %v4362_v30 = vld [vmem:[#allocation66_spill] sm:$0xff] }
 0x18e   : > { %v1072_v2 = vpop.permute.xlu0 %1071  ;;  %v1461_v6 = vsel %vm1460_vm10, %v1428_v35, %v1134_v11  ;;  %v1411_v54 = vsel %vm1394_vm8, %v1378_v23, %v974_v49  ;;  %v2178_v35 = vld [vmem:[%s2354_s27 + $0x8] sm:$0xff] }
 0x18f   : > { %893 = vrot.lane.b32.xlu1 %v4357_v55, %s2273_s4  ;;  %2048 = vmatprep.mubr.msk.f32.mxu0 %vm1498_vm11, %v1461_v6  ;;  %v1444_v31 = vsel %vm1427_vm9, %v1411_v54, %v1070_v20  ;;  %v1247_v55 = vsel %vm1229_vm2, %v3578_v57, %v4358_v47  ;;  %v4361_v20 = vld [vmem:[#allocation38_spill] sm:$0xff] }
 0x190   : > { %861 = vrot.lane.b32.xlu0 %v4353_v19, %s2273_s4  ;;  %v4360_v19 = vld [vmem:[#allocation59_spill] sm:$0xff]  ;;  %v1280_v11 = vsel %vm1262_vm3, %v1247_v55, %v3138_v38 }
 0x191   : > { %v3574_v28 = vpop.permute.xlu1 %787  ;;  %v1231_v49 = vsel %vm1229_vm2, %v2178_v35, %v4360_v19  ;;  %v1313_v16 = vsel %vm1295_vm5, %v1280_v11, %v3353_v52  ;;  %v2179_v35 = vld [vmem:[%s2354_s27 + $0x150] sm:$0xff]  ;;  %v2182_v19 = vld [vmem:[%s2354_s27 + $0x98] sm:$0xff] }
 0x192   : > { %v1166_v5 = vpop.permute.xlu0 %1165  ;;  %v1264_v6 = vsel %vm1262_vm3, %v1231_v49, %v4362_v30  ;;  %v1346_v38 = vsel %vm1328_vm6, %v1313_v16, %v3505_v60 }
 0x193   : > { %1179 = vrot.lane.b32.xlu1 %v4359_v45, %s2276_s28  ;;  %v1477_v61 = vsel %vm1460_vm10, %v1444_v31, %v1166_v5  ;;  %v1297_v54 = vsel %vm1295_vm5, %v1264_v6, %v3253_v37  ;;  %v1379_v47 = vsel %vm1361_vm7, %v1346_v38, %v3515_v34  ;;  %v2183_v38 = vld [vmem:[%s2354_s27 + $0x18] sm:$0xff] }
 0x194   : > { %1147 = vrot.lane.b32.xlu0 %v4361_v20, %s2276_s28  ;;  %2072 = vmatprep.mubr.msk.f32.mxu1 %vm1498_vm11, %v1477_v61  ;;  %v1330_v5 = vsel %vm1328_vm6, %v1297_v54, %v3441_v27  ;;  %v1412_v37 = vsel %vm1394_vm8, %v1379_v47, %v976_v13  ;;  %v2180_v13 = vld [vmem:[%s2354_s27 + $0x90] sm:$0xff] }
 0x195   : > { %v3598_v23 = vpop.permute.xlu1 %881  ;;  %v1363_v52 = vsel %vm1361_vm7, %v1330_v5, %v3517_v36  ;;  %v1445_v27 = vsel %vm1427_vm9, %v1412_v37, %v1072_v2  ;;  %v4364_v5 = vld [vmem:[#allocation53_spill] sm:$0xff] }
 0x196   : > { %v850_v31 = vpop.permute.xlu0 %849  ;;  %v1396_v60 = vsel %vm1394_vm8, %v1363_v52, %v3527_v29  ;;  %v1232_v47 = vsel %vm1229_vm2, %v2183_v38, %v4364_v5  ;;  %v4365_v52 = vld [vmem:[#allocation41_spill] sm:$0xff] }
 0x197   : > { %895 = vrot.lane.b32.xlu1 %v4359_v45, %s2273_s4  ;;  %v1429_v34 = vsel %vm1427_vm9, %v1396_v60, %v1040_v21  ;;  %v2181_v21 = vld [vmem:[%s2354_s27 + $0x158] sm:$0xff]  ;;  %v4366_v37 = vld [vmem:[#allocation69_spill] sm:$0xff] }
 0x198   : > { %863 = vrot.lane.b32.xlu0 %v4361_v20, %s2273_s4  ;;  %v4363_v20 = vld [vmem:[#allocation29_spill] sm:$0xff]  ;;  %v4367_v60 = vld [vmem:[#allocation28_spill] sm:$0xff] }
 0x199   : > { %v1168_v55 = vpop.permute.xlu1 %1167 }
 0x19a   : > { %v1478_v45 = vsel %vm1460_vm10, %v1445_v27, %v1168_v55  ;;  %v1136_v61 = vpop.permute.xlu0 %1135 }
 0x19b   : > { %v1462_v36 = vsel %vm1460_vm10, %v1429_v34, %v1136_v61  ;;  %989 = vrot.lane.b32.xlu1 %v2179_v35, %s2274_s5  ;;  %2073 = vmatmul.mubr.msk.f32.vlgmr.msra.gmra.mxu1 %vm1498_vm11, %v1478_v45  ;;  %v3662_v61 = vld [vmem:[%s2354_s27 + $0xd8] sm:$0xff] }
 0x19c   : > { %957 = vrot.lane.b32.xlu0 %v2180_v13, %s2274_s5  ;;  %2049 = vmatmul.mubr.msk.f32.vlgmr.msra.gmra.mxu0 %vm1498_vm11, %v1462_v36  ;;  %v4368_v36 = vld [vmem:[#allocation65_spill] sm:$0xff] }
 0x19d   : > { %v3627_v29 = vpop.permute.xlu1 %883  ;;  %v1248_v35 = vsel %vm1229_vm2, %v3662_v61, %v4368_v36  ;;  %v4375_v36 = vld [vmem:[#allocation68_spill] sm:$0xff] }
 0x19e   : > { %v3629_v2 = vpop.permute.xlu0 %851 }
 0x19f   : > { %991 = vrot.lane.b32.xlu1 %v2181_v21, %s2274_s5 }
 0x1a0   : > { %959 = vrot.lane.b32.xlu0 %v2182_v19, %s2274_s5 }
 0x1a1   : > { %v978_v49 = vpop.permute.xlu1 %977 }
 0x1a2   : > { %v946_v11 = vpop.permute.xlu0 %945 }
 0x1a3   : > { %1085 = vrot.lane.b32.xlu1 %v4363_v20, %s2275_s16 }
 0x1a4   : > { %1053 = vrot.lane.b32.xlu0 %v4307_v56, %s2275_s16  ;;  %v1265_v56 = vsel %vm1262_vm3, %v1232_v47, %v4366_v37  ;;  %v3690_v37 = vld [vmem:[%s2354_s27 + $0xe0] sm:$0xff] }
 0x1a5   : > { %v980_v30 = vpop.permute.xlu1 %979 }
 0x1a6   : > { %v948_v6 = vpop.permute.xlu0 %947 }
 0x1a7   : > { %1055 = vrot.lane.b32.xlu1 %v4306_v44, %s2275_s16  ;;  %v1298_v44 = vsel %vm1295_vm5, %v1265_v56, %v3269_v3  ;;  %v4369_v3 = vld [vmem:[#allocation58_spill] sm:$0xff] }
 0x1a8   : > { %801 = vrot.lane.b32.xlu0 %v4363_v20, %s2272_s3  ;;  %v1331_v55 = vsel %vm1328_vm6, %v1298_v44, %v3451_v9  ;;  %v1281_v9 = vsel %vm1262_vm3, %v1248_v35, %v3148_v4  ;;  %v2186_v44 = vld [vmem:[%s2354_s27 + $0x20] sm:$0xff] }
 0x1a9   : > { %v1074_v16 = vpop.permute.xlu1 %1073  ;;  %v1364_v45 = vsel %vm1361_vm7, %v1331_v55, %v850_v31  ;;  %v1314_v19 = vsel %vm1295_vm5, %v1281_v9, %v3363_v17  ;;  %v4373_v55 = vld [vmem:[#allocation6_spill] sm:$0xff] }
 0x1aa   : > { %v1042_v54 = vpop.permute.xlu0 %1041  ;;  %v1397_v13 = vsel %vm1394_vm8, %v1364_v45, %v946_v11  ;;  %v1347_v11 = vsel %vm1328_vm6, %v1314_v19, %v3546_v63  ;;  %v4370_v63 = vld [vmem:[#allocation64_spill] sm:$0xff] }
 0x1ab   : > { %1149 = vrot.lane.b32.xlu1 %v4365_v52, %s2276_s28  ;;  %v1430_v31 = vsel %vm1427_vm9, %v1397_v13, %v1042_v54  ;;  %v1380_v4 = vsel %vm1361_vm7, %v1347_v11, %v3598_v23  ;;  %v1249_v56 = vsel %vm1229_vm2, %v3690_v37, %v4370_v63  ;;  %v4371_v23 = vld [vmem:[#allocation56_spill] sm:$0xff] }
 0x1ac   : > { %1087 = vrot.lane.b32.xlu0 %v4367_v60, %s2275_s16  ;;  %v1413_v17 = vsel %vm1394_vm8, %v1380_v4, %v978_v49  ;;  %v1282_v45 = vsel %vm1262_vm3, %v1249_v56, %v4373_v55 }
 0x1ad   : > { %v1044_v27 = vpop.permute.xlu1 %1043  ;;  %v1446_v5 = vsel %vm1427_vm9, %v1413_v17, %v1074_v16  ;;  %v4374_v16 = vld [vmem:[#allocation40_spill] sm:$0xff]  ;;  %v1315_v13 = vsel %vm1295_vm5, %v1282_v45, %v3361_v1 }
 0x1ae   : > { %v3656_v34 = vpop.permute.xlu0 %789 }
 0x1af   : > { %803 = vrot.lane.b32.xlu1 %v4367_v60, %s2272_s3 }
 0x1b0   : > { %1181 = vrot.lane.b32.xlu0 %v4369_v3, %s2276_s28 }
 0x1b1   : > { %v1138_v21 = vpop.permute.xlu1 %1137 }
 0x1b2   : > { %v1463_v20 = vsel %vm1460_vm10, %v1430_v31, %v1138_v21  ;;  %v1076_v38 = vpop.permute.xlu0 %1075  ;;  %v1348_v31 = vsel %vm1328_vm6, %v1315_v13, %v3574_v28  ;;  %v1333_v13 = vsel %vm1328_vm6, %v3287_v42, %v3459_v15  ;;  %v1349_v42 = vsel %vm1328_vm6, %v3375_v53, %v3656_v34  ;;  %v4382_v53 = vld [vmem:[#allocation60_spill] sm:$0xff]  ;;  %v4383_v34 = vld [vmem:[#allocation42_spill] sm:$0xff] }
 0x1b3   : > { %897 = vrot.lane.b32.xlu1 %v4369_v3, %s2273_s4  ;;  %2051 = vmatprep.mubr.msk.f32.mxu0 %vm1498_vm11, %v1463_v20  ;;  %v1381_v20 = vsel %vm1361_vm7, %v1348_v31, %v3627_v29 }
 0x1b4   : > { %865 = vrot.lane.b32.xlu0 %v4365_v52, %s2273_s4  ;;  %v4372_v52 = vld [vmem:[#allocation57_spill] sm:$0xff] }
 0x1b5   : > { %v3686_v54 = vpop.permute.xlu1 %791  ;;  %v1233_v49 = vsel %vm1229_vm2, %v2186_v44, %v4372_v52 }
 0x1b6   : > { %v1170_v47 = vpop.permute.xlu0 %1169  ;;  %v1266_v35 = vsel %vm1262_vm3, %v1233_v49, %v4375_v36  ;;  %v4378_v49 = vld [vmem:[#allocation13_spill] sm:$0xff]  ;;  %v4380_v36 = vld [vmem:[#allocation30_spill] sm:$0xff] }
 0x1b7   : > { %v1479_v60 = vsel %vm1460_vm10, %v1446_v5, %v1170_v47  ;;  %1183 = vrot.lane.b32.xlu1 %v4371_v23, %s2276_s28  ;;  %v1299_v9 = vsel %vm1295_vm5, %v1266_v35, %v3267_v62  ;;  %v1414_v62 = vsel %vm1394_vm8, %v1381_v20, %v980_v30  ;;  %v2188_v30 = vld [vmem:[%s2354_s27 + $0xa8] sm:$0xff]  ;;  %v2189_v47 = vld [vmem:[%s2354_s27 + $0x170] sm:$0xff]  ;;  %v4381_v20 = vld [vmem:[#allocation61_spill] sm:$0xff] }
 0x1b8   : > { %1151 = vrot.lane.b32.xlu0 %v4374_v16, %s2276_s28  ;;  %2075 = vmatprep.mubr.msk.f32.mxu1 %vm1498_vm11, %v1479_v60  ;;  %v1332_v19 = vsel %vm1328_vm6, %v1299_v9, %v3449_v33  ;;  %v1447_v33 = vsel %vm1427_vm9, %v1414_v62, %v1076_v38  ;;  %v4376_v60 = vld [vmem:[#allocation31_spill] sm:$0xff] }
 0x1b9   : > { %v886_v3 = vpop.permute.xlu1 %885  ;;  %v1365_v1 = vsel %vm1361_vm7, %v1332_v19, %v3629_v2  ;;  %v2187_v2 = vld [vmem:[%s2354_s27 + $0x168] sm:$0xff] }
 0x1ba   : > { %v854_v21 = vpop.permute.xlu0 %853  ;;  %v1398_v28 = vsel %vm1394_vm8, %v1365_v1, %v948_v6  ;;  %v1382_v15 = vsel %vm1361_vm7, %v1349_v42, %v886_v3  ;;  %v4388_v42 = vld [vmem:[#allocation45_spill] sm:$0xff] }
 0x1bb   : > { %899 = vrot.lane.b32.xlu1 %v4371_v23, %s2273_s4  ;;  %v1431_v29 = vsel %vm1427_vm9, %v1398_v28, %v1044_v27  ;;  %v2190_v27 = vld [vmem:[%s2354_s27 + $0xb0] sm:$0xff]  ;;  %v4377_v23 = vld [vmem:[#allocation14_spill] sm:$0xff]  ;;  %v1366_v31 = vsel %vm1361_vm7, %v1333_v13, %v854_v21  ;;  %v4386_v13 = vld [vmem:[#allocation16_spill] sm:$0xff] }
 0x1bc   : > { %867 = vrot.lane.b32.xlu0 %v4374_v16, %s2273_s4  ;;  %v4379_v16 = vld [vmem:[#allocation43_spill] sm:$0xff] }
 0x1bd   : > { %v1172_v11 = vpop.permute.xlu1 %1171 }
 0x1be   : > { %v1480_v4 = vsel %vm1460_vm10, %v1447_v33, %v1172_v11  ;;  %v1140_v17 = vpop.permute.xlu0 %1139 }
 0x1bf   : > { %v1464_v5 = vsel %vm1460_vm10, %v1431_v29, %v1140_v17  ;;  %993 = vrot.lane.b32.xlu1 %v2187_v2, %s2274_s5  ;;  %2076 = vmatmul.mubr.msk.f32.gmra.mxu1 %vm1498_vm11, %v1480_v4 }
 0x1c0   : > { %961 = vrot.lane.b32.xlu0 %v2188_v30, %s2274_s5  ;;  %2052 = vmatmul.mubr.msk.f32.gmra.mxu0 %vm1498_vm11, %v1464_v5  ;;  %v1350_v5 = vsel %vm1328_vm6, %v3371_v59, %v3686_v54  ;;  %v1334_v30 = vsel %vm1328_vm6, %v3283_v25, %v3457_v0 }
 0x1c1   : > { %v888_v6 = vpop.permute.xlu1 %887 }
 0x1c2   : > { %v856_v38 = vpop.permute.xlu0 %855 }
 0x1c3   : > { %995 = vrot.lane.b32.xlu1 %v2189_v47, %s2274_s5  ;;  %v1383_v47 = vsel %vm1361_vm7, %v1350_v5, %v888_v6 }
 0x1c4   : > { %963 = vrot.lane.b32.xlu0 %v2190_v27, %s2274_s5  ;;  %v1367_v27 = vsel %vm1361_vm7, %v1334_v30, %v856_v38  ;;  %v4384_v38 = vld [vmem:[#allocation71_spill] sm:$0xff] }
 0x1c5   : > { %v982_v63 = vpop.permute.xlu1 %981 }
 0x1c6   : > { %v950_v56 = vpop.permute.xlu0 %949  ;;  %v1415_v21 = vsel %vm1394_vm8, %v1382_v15, %v982_v63 }
 0x1c7   : > { %1089 = vrot.lane.b32.xlu1 %v4376_v60, %s2275_s16  ;;  %v1399_v19 = vsel %vm1394_vm8, %v1366_v31, %v950_v56 }
 0x1c8   : > { %1057 = vrot.lane.b32.xlu0 %v4377_v23, %s2275_s16  ;;  %v4385_v23 = vld [vmem:[#allocation70_spill] sm:$0xff] }
 0x1c9   : > { %v984_v44 = vpop.permute.xlu1 %983 }
 0x1ca   : > { %v952_v52 = vpop.permute.xlu0 %951  ;;  %v1416_v63 = vsel %vm1394_vm8, %v1383_v47, %v984_v44  ;;  %v439_v44 = vrot.slane %v4385_v23, 1 }
 0x1cb   : > { %1059 = vrot.lane.b32.xlu1 %v4378_v49, %s2275_s16  ;;  %v1400_v56 = vsel %vm1394_vm8, %v1367_v27, %v952_v52  ;;  %v438_v52 = vrot.slane %v4384_v38, 1 }
 0x1cc   : > { %805 = vrot.lane.b32.xlu0 %v4376_v60, %s2272_s3 }
 0x1cd   : > { %v1078_v55 = vpop.permute.xlu1 %1077 }
 0x1ce   : > { %v1046_v45 = vpop.permute.xlu0 %1045  ;;  %v1448_v29 = vsel %vm1427_vm9, %v1415_v21, %v1078_v55 }
 0x1cf   : > { %1153 = vrot.lane.b32.xlu1 %v4379_v16, %s2276_s28  ;;  %v1432_v1 = vsel %vm1427_vm9, %v1399_v19, %v1046_v45  ;;  %v440_v45 = vsel %vm273_vm0, %v438_v52, %v439_v44 }
 0x1d0   : > { %1091 = vrot.lane.b32.xlu0 %v4380_v36, %s2275_s16 }
 0x1d1   : > { %v1048_v35 = vpop.permute.xlu1 %1047 }
 0x1d2   : > { %v3755_v9 = vpop.permute.xlu0 %793  ;;  %v1433_v60 = vsel %vm1427_vm9, %v1400_v56, %v1048_v35  ;;  %v221_v35 = vld [vmem:[%s2354_s27 + $0x190] sm:$0x3] }
 0x1d3   : > { %807 = vrot.lane.b32.xlu1 %v4380_v36, %s2272_s3  ;;  %v441_v31 = vrot.slane %v221_v35, 1 }
 0x1d4   : > { %1185 = vrot.lane.b32.xlu0 %v4381_v20, %s2276_s28 }
 0x1d5   : > { %v1142_v62 = vpop.permute.xlu1 %1141 }
 0x1d6   : > { %v1465_v28 = vsel %vm1460_vm10, %v1432_v1, %v1142_v62  ;;  %v1080_v33 = vpop.permute.xlu0 %1079  ;;  %v443_v1 = vrot.slane %v4384_v38, 2 }
 0x1d7   : > { %901 = vrot.lane.b32.xlu1 %v4381_v20, %s2273_s4  ;;  %2054 = vmatprep.mubr.msk.f32.mxu0 %vm1498_vm11, %v1465_v28  ;;  %v1449_v59 = vsel %vm1427_vm9, %v1416_v63, %v1080_v33  ;;  %v4387_v20 = vld [vmem:[#allocation15_spill] sm:$0xff]  ;;  %v442_v28 = vsel %vm273_vm0, %v439_v44, %v441_v31  ;;  %v222_v44 = vld [vmem:[%s2354_s27 + $0x198] sm:$0xff] }
 0x1d8   : > { %869 = vrot.lane.b32.xlu0 %v4379_v16, %s2273_s4 }
 0x1d9   : > { %v3775_v11 = vpop.permute.xlu1 %795 }
 0x1da   : > { %v1174_v4 = vpop.permute.xlu0 %1173 }
 0x1db   : > { %v1481_v17 = vsel %vm1460_vm10, %v1448_v29, %v1174_v4  ;;  %1187 = vrot.lane.b32.xlu1 %v4382_v53, %s2276_s28  ;;  %v1335_v29 = vsel %vm1328_vm6, %v3299_v8, %v3467_v10  ;;  %v1351_v8 = vsel %vm1328_vm6, %v3387_v12, %v3755_v9  ;;  %v4389_v9 = vld [vmem:[#allocation44_spill] sm:$0xff] }
 0x1dc   : > { %1155 = vrot.lane.b32.xlu0 %v4383_v34, %s2276_s28  ;;  %2078 = vmatprep.mubr.msk.f32.mxu1 %vm1498_vm11, %v1481_v17 }
 0x1dd   : > { %v890_v3 = vpop.permute.xlu1 %889 }
 0x1de   : > { %v858_v2 = vpop.permute.xlu0 %857  ;;  %v1384_v10 = vsel %vm1361_vm7, %v1351_v8, %v890_v3 }
 0x1df   : > { %903 = vrot.lane.b32.xlu1 %v4382_v53, %s2273_s4  ;;  %v1368_v17 = vsel %vm1361_vm7, %v1335_v29, %v858_v2 }
 0x1e0   : > { %871 = vrot.lane.b32.xlu0 %v4383_v34, %s2273_s4  ;;  %v446_v34 = vrot.slane %v221_v35, 2 }
 0x1e1   : > { %v1176_v54 = vpop.permute.xlu1 %1175 }
 0x1e2   : > { %v1482_v25 = vsel %vm1460_vm10, %v1449_v59, %v1176_v54  ;;  %v1144_v0 = vpop.permute.xlu0 %1143 }
 0x1e3   : > { %v1466_v6 = vsel %vm1460_vm10, %v1433_v60, %v1144_v0  ;;  %997 = vrot.lane.b32.xlu1 %v4384_v38, %s2274_s5  ;;  %2079 = vmatmul.mubr.msk.f32.gmra.mxu1 %vm1498_vm11, %v1482_v25  ;;  %v1352_v60 = vsel %vm1328_vm6, %v3383_v14, %v3775_v11  ;;  %v1336_v0 = vsel %vm1328_vm6, %v3295_v43, %v3465_v50 }
 0x1e4   : > { %965 = vrot.lane.b32.xlu0 %v3552_v32, %s2274_s5  ;;  %2055 = vmatmul.mubr.msk.f32.gmra.mxu0 %vm1498_vm11, %v1466_v6 }
 0x1e5   : > { %v892_v49 = vpop.permute.xlu1 %891 }
 0x1e6   : > { %v860_v55 = vpop.permute.xlu0 %859  ;;  %v1385_v6 = vsel %vm1361_vm7, %v1352_v60, %v892_v49 }
 0x1e7   : > { %999 = vrot.lane.b32.xlu1 %v4385_v23, %s2274_s5  ;;  %v1369_v38 = vsel %vm1361_vm7, %v1336_v0, %v860_v55 }
 0x1e8   : > { %967 = vrot.lane.b32.xlu0 %v3578_v57, %s2274_s5  ;;  %v444_v57 = vrot.slane %v4385_v23, 2 }
 0x1e9   : > { %v986_v16 = vpop.permute.xlu1 %985 }
 0x1ea   : > { %v954_v36 = vpop.permute.xlu0 %953  ;;  %v445_v21 = vsel %vm354_vm1, %v443_v1, %v444_v57  ;;  %v447_v2 = vsel %vm354_vm1, %v444_v57, %v446_v34  ;;  %v1417_v63 = vsel %vm1394_vm8, %v1384_v10, %v986_v16  ;;  %v451_v16 = vrot.slane %v222_v44, 1 }
 0x1eb   : > { %1093 = vrot.lane.b32.xlu1 %v440_v45, %s2275_s16  ;;  %v1401_v53 = vsel %vm1394_vm8, %v1368_v17, %v954_v36  ;;  %v456_v1 = vrot.slane %v222_v44, 2  ;;  %v1337_v17 = vsel %vm1328_vm6, %v3311_v58, %v3475_v24 }
 0x1ec   : > { %1061 = vrot.lane.b32.xlu0 %v4386_v13, %s2275_s16  ;;  %v224_v13 = vld [vmem:[%s2354_s27 + $0x1a8] sm:$0x3] }
 0x1ed   : > { %v988_v32 = vpop.permute.xlu1 %987 }
 0x1ee   : > { %v956_v19 = vpop.permute.xlu0 %955  ;;  %v1418_v23 = vsel %vm1394_vm8, %v1385_v6, %v988_v32 }
 0x1ef   : > { %1063 = vrot.lane.b32.xlu1 %v4387_v20, %s2275_s16  ;;  %v1402_v14 = vsel %vm1394_vm8, %v1369_v38, %v956_v19  ;;  %v454_v19 = vrot.slane %v224_v13, 1 }
 0x1f0   : > { %809 = vrot.lane.b32.xlu0 %v440_v45, %s2272_s3  ;;  %v223_v45 = vld [vmem:[%s2354_s27 + $0x1a0] sm:$0xff]  ;;  %s158_s27 = sand.u32 1, %s2251_s10  }
 0x1f1   : > { %v1082_v62 = vpop.permute.xlu1 %1081  ;;  %v452_v36 = vrot.slane %v223_v45, 1  ;;  %s1960_s30 = sshll.u32 %s158_s27, 8 }
 0x1f2   : > { %v1050_v33 = vpop.permute.xlu0 %1049  ;;  %v1450_v59 = vsel %vm1427_vm9, %v1417_v63, %v1082_v62 }
 0x1f3   : > { %1157 = vrot.lane.b32.xlu1 %v4388_v42, %s2276_s28  ;;  %v1434_v5 = vsel %vm1427_vm9, %v1401_v53, %v1050_v33  ;;  %v453_v31 = vsel %vm273_vm0, %v451_v16, %v452_v36  ;;  %v455_v62 = vsel %vm273_vm0, %v452_v36, %v454_v19 }
 0x1f4   : > { %1095 = vrot.lane.b32.xlu0 %v442_v28, %s2275_s16 }
 0x1f5   : > { %v1052_v15 = vpop.permute.xlu1 %1051 }
 0x1f6   : > { %v3832_v4 = vpop.permute.xlu0 %797  ;;  %v1435_v43 = vsel %vm1427_vm9, %v1402_v14, %v1052_v15 }
 0x1f7   : > { %811 = vrot.lane.b32.xlu1 %v442_v28, %s2272_s3  ;;  %v1353_v58 = vsel %vm1328_vm6, %v3399_v46, %v3832_v4  ;;  %s3970_s3 = scalar_lea.vmem [#allocation2], %s1960_s30 }
 0x1f8   : > { %1189 = vrot.lane.b32.xlu0 %v445_v21, %s2276_s28 }
 0x1f9   : > { %v1146_v30 = vpop.permute.xlu1 %1145 }
 0x1fa   : > { %v1467_v47 = vsel %vm1460_vm10, %v1434_v5, %v1146_v30  ;;  %v1084_v27 = vpop.permute.xlu0 %1083 }
 0x1fb   : > { %905 = vrot.lane.b32.xlu1 %v445_v21, %s2273_s4  ;;  %2057 = vmatprep.mubr.msk.f32.mxu0 %vm1498_vm11, %v1467_v47  ;;  %v1451_v11 = vsel %vm1427_vm9, %v1418_v23, %v1084_v27 }
 0x1fc   : > { %873 = vrot.lane.b32.xlu0 %v4388_v42, %s2273_s4  ;;  %v459_v42 = vrot.slane %v224_v13, 2 }
 0x1fd   : > { %v3850_v56 = vpop.permute.xlu1 %799 }
 0x1fe   : > { %v1178_v54 = vpop.permute.xlu0 %1177  ;;  %v1354_v46 = vsel %vm1328_vm6, %v3395_v41, %v3850_v56 }
 0x1ff   : > { %v1483_v12 = vsel %vm1460_vm10, %v1450_v59, %v1178_v54  ;;  %1191 = vrot.lane.b32.xlu1 %v447_v2, %s2276_s28  ;;  %v1338_v59 = vsel %vm1328_vm6, %v3307_v51, %v3473_v26 }
 0x200   : > { %1159 = vrot.lane.b32.xlu0 %v4389_v9, %s2276_s28  ;;  %2081 = vmatprep.mubr.msk.f32.mxu1 %vm1498_vm11, %v1483_v12 }
 0x201   : > { %v3858_v3 = vpop.permute.xlu1 %893 }
 0x202   : > { %v862_v25 = vpop.permute.xlu0 %861  ;;  %v1386_v24 = vsel %vm1361_vm7, %v1353_v58, %v3858_v3 }
 0x203   : > { %907 = vrot.lane.b32.xlu1 %v447_v2, %s2273_s4 }
 0x204   : > { %875 = vrot.lane.b32.xlu0 %v4389_v9, %s2273_s4  ;;  %s2000_s4 = sshll.u32 %s2259_s12, 12  ;;  %s4075_s12 = scalar_lea.sflag [#allocation3], %s158_s27 }
 0x205   : > { %v1180_v52 = vpop.permute.xlu1 %1179  ;;  %s4066_s8 = scalar_lea.hbm %s4123_s2, %s2000_s4 }
 0x206   : > { %v1484_v50 = vsel %vm1460_vm10, %v1451_v11, %v1180_v52  ;;  %v1148_v49 = vpop.permute.xlu0 %1147 }
 0x207   : > { %v1468_v55 = vsel %vm1460_vm10, %v1435_v43, %v1148_v49  ;;  %1001 = vrot.lane.b32.xlu1 %v222_v44, %s2274_s5  ;;  %2082 = vmatmul.mubr.msk.f32.gmra.mxu1 %vm1498_vm11, %v1484_v50  ;;  %v1339_v43 = vsel %vm1328_vm6, %v3323_v39, %v3483_v22 }
 0x208   : > { %969 = vrot.lane.b32.xlu0 %v3662_v61, %s2274_s5  ;;  %2058 = vmatmul.mubr.msk.f32.gmra.mxu0 %vm1498_vm11, %v1468_v55  ;;  %v457_v61 = vrot.slane %v223_v45, 2 }
 0x209   : > { %v896_v35 = vpop.permute.xlu1 %895 }
 0x20a   : > { %v864_v32 = vpop.permute.xlu0 %863  ;;  %v1387_v54 = vsel %vm1361_vm7, %v1354_v46, %v896_v35 }
 0x20b   : > { %1003 = vrot.lane.b32.xlu1 %v223_v45, %s2274_s5  ;;  %v1371_v12 = vsel %vm1361_vm7, %v1338_v59, %v864_v32  ;;  %v4390_v32 = vld [vmem:[#allocation17_spill] sm:$0xff] }
 0x20c   : > { %971 = vrot.lane.b32.xlu0 %v3690_v37, %s2274_s5  ;;  %v458_v37 = vsel %vm354_vm1, %v456_v1, %v457_v61  ;;  %s1873_s5 = sshll.u32 %s3970_s3, 4  ;;  %s4069_s5 = int_to_ptr.vmem [resolvable:$true] %s1873_s5 }
 0x20d   : > { %v990_v20 = vpop.permute.xlu1 %989  ;;  %s2191_s15 = scalar_lea.vmem %s4069_s5, 4096 }
 0x20e   : > { %v958_v57 = vpop.permute.xlu0 %957  ;;  %v1419_v27 = vsel %vm1394_vm8, %v1386_v24, %v990_v20  ;;  %p2192_p12 = scmp.ne.s32.totalorder %s4069_s5, %s2191_s15 }
 0x20f   : > { %1097 = vrot.lane.b32.xlu1 %v453_v31, %s2275_s16 }
 0x210   : > { %1065 = vrot.lane.b32.xlu0 %v4314_v40, %s2275_s16  ;;  %v460_v40 = vsel %vm354_vm1, %v457_v61, %v459_v42  ;;  %v4393_v42 = vld [vmem:[#allocation7_spill] sm:$0xff]  ;;  %p2193_p13 = pnand %p2192_p12, %p2334_p4 }
 0x211   : > { %v992_v28 = vpop.permute.xlu1 %991 }
 0x212   : > { %v960_v33 = vpop.permute.xlu0 %959  ;;  %v1420_v9 = vsel %vm1394_vm8, %v1387_v54, %v992_v28  ;;  %p2194_p0 = pneg %p2193_p13 }
 0x213   : > { %1099 = vrot.lane.b32.xlu1 %v455_v62, %s2275_s16  ;;  %v1404_v3 = vsel %vm1394_vm8, %v1371_v12, %v960_v33  ;;  %v4391_v62 = vld [vmem:[#allocation12_spill] sm:$0xff]  ;;  %v4394_v12 = vld [vmem:[#allocation47_spill] sm:$0xff] }
 0x214   : > { %1067 = vrot.lane.b32.xlu0 %v4313_v48, %s2275_s16  ;;  %v1370_v48 = vsel %vm1361_vm7, %v1337_v17, %v862_v25  ;;  %s2277_s16 = smov [#allocation2]  }
 0x215   : > { %v1086_v15 = vpop.permute.xlu1 %1085  ;;  %v1403_v34 = vsel %vm1394_vm8, %v1370_v48, %v958_v57  ;;  %s2195_s18 = sshll.u32 %s2277_s16, 4  ;;  %s2196_s18 = int_to_ptr.vmem [resolvable:$false] %s2195_s18 }
 0x216   : > { %v1054_v21 = vpop.permute.xlu0 %1053  ;;  %s2197_s20 = scalar_lea.vmem %s2196_s18, 8192  ;;  %p2198_p1 = scmp.lt.s32.totalorder %s4069_s5, %s2196_s18 }
 0x217   : > { %1193 = vrot.lane.b32.xlu1 %v458_v37, %s2276_s28  ;;  %v1436_v5 = vsel %vm1427_vm9, %v1403_v34, %v1054_v21  ;;  %v4392_v37 = vld [vmem:[#allocation33_spill] sm:$0xff]  ;;  %p2199_p2 = scmp.lt.s32.totalorder %s2197_s20, %s2191_s15 }
 0x218   : > { %1161 = vrot.lane.b32.xlu0 %v2822_v18, %s2276_s28 }
 0x219   : > { %v1056_v29 = vpop.permute.xlu1 %1055  ;;  %p2200_p3 = por %p2199_p2, %p2198_p1 }
 0x21a   : > { %v802_v53 = vpop.permute.xlu0 %801  ;;  %v1437_v0 = vsel %vm1427_vm9, %v1404_v3, %v1056_v29 }
 0x21b   : > { %1195 = vrot.lane.b32.xlu1 %v460_v40, %s2276_s28  ;;  %v1355_v31 = vsel %vm1328_vm6, %v4390_v32, %v802_v53  ;;  %p2201_p5 = pnand %p2200_p3, %p2194_p0 }
 0x21c   : > { %1163 = vrot.lane.b32.xlu0 %v2817_v7, %s2276_s28  ;;  %v1452_v7 = vsel %vm1427_vm9, %v1419_v27, %v1086_v15  ;;  %v1340_v15 = vsel %vm1328_vm6, %v4393_v42, %v4392_v37 }
 0x21d   : > { %v1150_v18 = vpop.permute.xlu1 %1149 }
 0x21e   : > { %v1469_v30 = vsel %vm1460_vm10, %v1436_v5, %v1150_v18  ;;  %v1088_v47 = vpop.permute.xlu0 %1087 }
 0x21f   : > { %2060 = vmatprep.mubr.msk.f32.mxu0 %vm1498_vm11, %v1469_v30  ;;  %v1453_v60 = vsel %vm1427_vm9, %v1420_v9, %v1088_v47  ;;  %v4395_v9 = vld [vmem:[#allocation9_spill] sm:$0xff] }
 0x220   : > { %v1341_v3 = vsel %vm1328_vm6, %v4395_v9, %v4394_v12  ;;  %v4404_v9 = vld [vmem:[#allocation46_spill] sm:$0xff] }
 0x221   : > { %v804_v8 = vpop.permute.xlu1 %803 }
 0x222   : > { %v1182_v10 = vpop.permute.xlu0 %1181  ;;  %v1356_v28 = vsel %vm1328_vm6, %v4391_v62, %v804_v8 }
 0x223   : > { %v1485_v2 = vsel %vm1460_vm10, %v1452_v7, %v1182_v10 }
 0x224   : > { %2084 = vmatprep.mubr.msk.f32.mxu1 %vm1498_vm11, %v1485_v2 }
 0x225   : > { %v898_v63 = vpop.permute.xlu1 %897 }
 0x226   : > { %v866_v4 = vpop.permute.xlu0 %865  ;;  %v1388_v19 = vsel %vm1361_vm7, %v1355_v31, %v898_v63 }
 0x227   : > { %v1372_v49 = vsel %vm1361_vm7, %v1339_v43, %v866_v4 }
 0x229   : > { %v1184_v25 = vpop.permute.xlu1 %1183 }
 0x22a   : > { %v1486_v41 = vsel %vm1460_vm10, %v1453_v60, %v1184_v25  ;;  %v1152_v56 = vpop.permute.xlu0 %1151 }
 0x22b   : > { %v1470_v6 = vsel %vm1460_vm10, %v1437_v0, %v1152_v56  ;;  %2085 = vmatmul.mubr.msk.f32.gmra.mxu1 %vm1498_vm11, %v1486_v41 }
 0x22c   : > { %2061 = vmatmul.mubr.msk.f32.gmra.mxu0 %vm1498_vm11, %v1470_v6 }
 0x22d   : > { %v900_v51 = vpop.permute.xlu1 %899 }
 0x22e   : > { %v868_v26 = vpop.permute.xlu0 %867  ;;  %v1389_v21 = vsel %vm1361_vm7, %v1356_v28, %v900_v51 }
 0x22f   : > { %v1373_v40 = vsel %vm1361_vm7, %v1340_v15, %v868_v26  ;;  %v4396_v26 = vld [vmem:[#allocation27_spill] sm:$0xff] }
 0x231   : > { %v994_v38 = vpop.permute.xlu1 %993 }
 0x232   : > { %v962_v23 = vpop.permute.xlu0 %961  ;;  %v1421_v39 = vsel %vm1394_vm8, %v1388_v19, %v994_v38 }
 0x233   : > { %v1405_v55 = vsel %vm1394_vm8, %v1372_v49, %v962_v23  ;;  %v4397_v49 = vld [vmem:[#allocation18_spill] sm:$0xff] }
 0x235   : > { %v996_v44 = vpop.permute.xlu1 %995 }
 0x236   : > { %v964_v14 = vpop.permute.xlu0 %963  ;;  %v1422_v29 = vsel %vm1394_vm8, %v1389_v21, %v996_v44 }
 0x237   : > { %v1406_v17 = vsel %vm1394_vm8, %v1373_v40, %v964_v14 }
 0x239   : > { %v1090_v11 = vpop.permute.xlu1 %1089 }
 0x23a   : > { %v1058_v52 = vpop.permute.xlu0 %1057  ;;  %v1454_v20 = vsel %vm1427_vm9, %v1421_v39, %v1090_v11 }
 0x23b   : > { %v1438_v16 = vsel %vm1427_vm9, %v1405_v55, %v1058_v52 }
 0x23d   : > { %v1060_v45 = vpop.permute.xlu1 %1059 }
 0x23e   : > { %v806_v50 = vpop.permute.xlu0 %805  ;;  %v1439_v34 = vsel %vm1427_vm9, %v1406_v17, %v1060_v45 }
 0x23f   : > { %v1357_v38 = vsel %vm1328_vm6, %v4396_v26, %v806_v50  ;;  %v4398_v50 = vld [vmem:[#allocation19_spill] sm:$0xff] }
 0x241   : > { %v1154_v36 = vpop.permute.xlu1 %1153 }
 0x242   : > { %v1471_v35 = vsel %vm1460_vm10, %v1438_v16, %v1154_v36  ;;  %v1092_v13 = vpop.permute.xlu0 %1091  ;;  %v4399_v36 = vld [vmem:[#allocation8_spill] sm:$0xff] }
 0x243   : > { %2063 = vmatprep.mubr.msk.f32.mxu0 %vm1498_vm11, %v1471_v35  ;;  %v1455_v53 = vsel %vm1427_vm9, %v1422_v29, %v1092_v13  ;;  %v1342_v35 = vsel %vm1328_vm6, %v4399_v36, %v4398_v50 }
 0x245   : > { %v808_v22 = vpop.permute.xlu1 %807 }
 0x246   : > { %v1186_v57 = vpop.permute.xlu0 %1185  ;;  %v1358_v55 = vsel %vm1328_vm6, %v4397_v49, %v808_v22 }
 0x247   : > { %v1487_v1 = vsel %vm1460_vm10, %v1454_v20, %v1186_v57 }
 0x248   : > { %2087 = vmatprep.mubr.msk.f32.mxu1 %vm1498_vm11, %v1487_v1 }
 0x249   : > { %v902_v61 = vpop.permute.xlu1 %901 }
 0x24a   : > { %v870_v33 = vpop.permute.xlu0 %869  ;;  %v1390_v23 = vsel %vm1361_vm7, %v1357_v38, %v902_v61 }
 0x24b   : > { %v1374_v25 = vsel %vm1361_vm7, %v1341_v3, %v870_v33  ;;  %v4405_v3 = vld [vmem:[#allocation10_spill] sm:$0xff] }
 0x24d   : > { %v1188_v48 = vpop.permute.xlu1 %1187 }
 0x24e   : > { %v1488_v5 = vsel %vm1460_vm10, %v1455_v53, %v1188_v48  ;;  %v1156_v18 = vpop.permute.xlu0 %1155 }
 0x24f   : > { %v1472_v30 = vsel %vm1460_vm10, %v1439_v34, %v1156_v18  ;;  %2088 = vmatmul.mubr.msk.f32.gmra.mxu1 %vm1498_vm11, %v1488_v5  ;;  %v4400_v5 = vld [vmem:[#allocation20_spill] sm:$0xff] }
 0x250   : > { %2064 = vmatmul.mubr.msk.f32.gmra.mxu0 %vm1498_vm11, %v1472_v30 }
 0x251   : > { %v904_v47 = vpop.permute.xlu1 %903 }
 0x252   : > { %v872_v58 = vpop.permute.xlu0 %871  ;;  %v1391_v13 = vsel %vm1361_vm7, %v1358_v55, %v904_v47  ;;  %v4401_v47 = vld [vmem:[#allocation32_spill] sm:$0xff] }
 0x253   : > { %v1375_v32 = vsel %vm1361_vm7, %v1342_v35, %v872_v58  ;;  %v4402_v58 = vld [vmem:[#allocation11_spill] sm:$0xff] }
 0x255   : > { %v998_v24 = vpop.permute.xlu1 %997 }
 0x256   : > { %v966_v27 = vpop.permute.xlu0 %965  ;;  %v1423_v44 = vsel %vm1394_vm8, %v1390_v23, %v998_v24  ;;  %v1343_v24 = vsel %vm1328_vm6, %v4402_v58, %v4401_v47 }
 0x257   : > { %v1407_v0 = vsel %vm1394_vm8, %v1374_v25, %v966_v27 }
 0x259   : > { %v1000_v8 = vpop.permute.xlu1 %999 }
 0x25a   : > { %v968_v7 = vpop.permute.xlu0 %967  ;;  %v1424_v31 = vsel %vm1394_vm8, %v1391_v13, %v1000_v8 }
 0x25b   : > { %v2074_v10 = vpop.f32.mrf.mxu1  ;;  %v1408_v19 = vsel %vm1394_vm8, %v1375_v32, %v968_v7 }
 0x25c   : > { %v2050_v2 = vpop.f32.mrf.mxu0  ;;  %1841 = vst [vmem:[%s3970_s3 + $0x88] sm:$0xff] %v2074_v10 }
 0x25d   : > { %1825 = vst [vmem:[%s3970_s3 + $0x8] sm:$0xff] %v2050_v2  ;;  %v1094_v63 = vpop.permute.xlu1 %1093  ;;  %v1745_v46 = vpop.f32.mrf.mxu1 }
 0x25e   : > { %v1665_v4 = vpop.f32.mrf.mxu0  ;;  %1840 = vst [vmem:[%s3970_s3 + $0x80] sm:$0xff] %v1745_v46  ;;  %v1062_v59 = vpop.permute.xlu0 %1061  ;;  %v1456_v11 = vsel %vm1427_vm9, %v1423_v44, %v1094_v63  ;;  %v4403_v46 = vld [vmem:[#allocation5_spill] sm:$0xff] }
 0x25f   : > { %1824 = vst [vmem:[%s3970_s3] sm:$0xff] %v1665_v4  ;;  %v1440_v41 = vsel %vm1427_vm9, %v1407_v0, %v1062_v59 }
 0x261   : > { %v1064_v54 = vpop.permute.xlu1 %1063 }
 0x262   : > { %v810_v60 = vpop.permute.xlu0 %809  ;;  %v1441_v22 = vsel %vm1427_vm9, %v1408_v19, %v1064_v54 }
 0x263   : > { %v1359_v18 = vsel %vm1328_vm6, %v4400_v5, %v810_v60  ;;  %v1344_v60 = vsel %vm1328_vm6, %v4405_v3, %v4404_v9 }
 0x265   : > { %v1158_v56 = vpop.permute.xlu1 %1157 }
 0x266   : > { %v1473_v6 = vsel %vm1460_vm10, %v1440_v41, %v1158_v56  ;;  %v1096_v51 = vpop.permute.xlu0 %1095 }
 0x267   : > { %2066 = vmatprep.mubr.msk.f32.mxu0 %vm1498_vm11, %v1473_v6  ;;  %v1457_v39 = vsel %vm1427_vm9, %v1424_v31, %v1096_v51 }
 0x269   : > { %v812_v14 = vpop.permute.xlu1 %811 }
 0x26a   : > { %v1190_v52 = vpop.permute.xlu0 %1189  ;;  %v1360_v4 = vsel %vm1328_vm6, %v4403_v46, %v812_v14 }
 0x26b   : > { %v1489_v45 = vsel %vm1460_vm10, %v1456_v11, %v1190_v52 }
 0x26c   : > { %2090 = vmatprep.mubr.msk.f32.mxu1 %vm1498_vm11, %v1489_v45 }
 0x26d   : > { %v906_v43 = vpop.permute.xlu1 %905 }
 0x26e   : > { %v874_v16 = vpop.permute.xlu0 %873  ;;  %v1392_v27 = vsel %vm1361_vm7, %v1359_v18, %v906_v43 }
 0x26f   : > { %v1376_v8 = vsel %vm1361_vm7, %v1343_v24, %v874_v16 }
 0x271   : > { %v1192_v20 = vpop.permute.xlu1 %1191 }
 0x272   : > { %v1490_v57 = vsel %vm1460_vm10, %v1457_v39, %v1192_v20  ;;  %v1160_v1 = vpop.permute.xlu0 %1159 }
 0x273   : > { %v1474_v61 = vsel %vm1460_vm10, %v1441_v22, %v1160_v1  ;;  %2091 = vmatmul.mubr.msk.f32.gmra.mxu1 %vm1498_vm11, %v1490_v57 }
 0x274   : > { %2067 = vmatmul.mubr.msk.f32.gmra.mxu0 %vm1498_vm11, %v1474_v61 }
 0x275   : > { %v908_v62 = vpop.permute.xlu1 %907 }
 0x276   : > { %v876_v28 = vpop.permute.xlu0 %875  ;;  %v1393_v25 = vsel %vm1361_vm7, %v1360_v4, %v908_v62 }
 0x277   : > { %v1377_v41 = vsel %vm1361_vm7, %v1344_v60, %v876_v28 }
 0x279   : > { %v1002_v33 = vpop.permute.xlu1 %1001 }
 0x27a   : > { %v970_v37 = vpop.permute.xlu0 %969  ;;  %v1425_v7 = vsel %vm1394_vm8, %v1392_v27, %v1002_v33 }
 0x27b   : > { %v1409_v10 = vsel %vm1394_vm8, %v1376_v8, %v970_v37 }
 0x27d   : > { %v1004_v42 = vpop.permute.xlu1 %1003 }
 0x27e   : > { %v972_v15 = vpop.permute.xlu0 %971  ;;  %v1426_v56 = vsel %vm1394_vm8, %v1393_v25, %v1004_v42 }
 0x27f   : > { %v2077_v21 = vpop.f32.mrf.mxu1  ;;  %v1410_v6 = vsel %vm1394_vm8, %v1377_v41, %v972_v15 }
 0x280   : > { %v2053_v40 = vpop.f32.mrf.mxu0  ;;  %1843 = vst [vmem:[%s3970_s3 + $0x98] sm:$0xff] %v2077_v21 }
 0x281   : > { %1827 = vst [vmem:[%s3970_s3 + $0x18] sm:$0xff] %v2053_v40  ;;  %v1098_v29 = vpop.permute.xlu1 %1097  ;;  %v1755_v17 = vpop.f32.mrf.mxu1 }
 0x282   : > { %v1675_v53 = vpop.f32.mrf.mxu0  ;;  %1842 = vst [vmem:[%s3970_s3 + $0x90] sm:$0xff] %v1755_v17  ;;  %v1066_v48 = vpop.permute.xlu0 %1065  ;;  %v1458_v2 = vsel %vm1427_vm9, %v1425_v7, %v1098_v29 }
 0x283   : > { %1826 = vst [vmem:[%s3970_s3 + $0x10] sm:$0xff] %v1675_v53  ;;  %v1442_v59 = vsel %vm1427_vm9, %v1409_v10, %v1066_v48 }
 0x285   : > { %v1100_v34 = vpop.permute.xlu1 %1099 }
 0x286   : > { %v1068_v30 = vpop.permute.xlu0 %1067  ;;  %v1459_v51 = vsel %vm1427_vm9, %v1426_v56, %v1100_v34 }
 0x287   : > { %v1443_v38 = vsel %vm1427_vm9, %v1410_v6, %v1068_v30 }
 0x289   : > { %v1194_v63 = vpop.permute.xlu1 %1193 }
 0x28a   : > { %v1491_v54 = vsel %vm1460_vm10, %v1458_v2, %v1194_v63  ;;  %v1162_v12 = vpop.permute.xlu0 %1161 }
 0x28b   : > { %v1475_v0 = vsel %vm1460_vm10, %v1442_v59, %v1162_v12  ;;  %2093 = vmatprep.mubr.msk.f32.mxu1 %vm1498_vm11, %v1491_v54 }
 0x28c   : > { %2069 = vmatprep.mubr.msk.f32.mxu0 %vm1498_vm11, %v1475_v0 }
 0x28d   : > { %v1196_v26 = vpop.permute.xlu1 %1195 }
 0x28e   : > { %v1492_v23 = vsel %vm1460_vm10, %v1459_v51, %v1196_v26  ;;  %v1164_v44 = vpop.permute.xlu0 %1163 }
 0x28f   : > { %v1476_v14 = vsel %vm1460_vm10, %v1443_v38, %v1164_v44  ;;  %2094 = vmatmul.mubr.msk.f32.gmra.mxu1 %vm1498_vm11, %v1492_v23 }
 0x290   : > { %2070 = vmatmul.mubr.msk.f32.gmra.mxu0 %vm1498_vm11, %v1476_v14 }
 0x2a3   : > { %v2080_v11 = vpop.f32.mrf.mxu1 }
 0x2a4   : > { %v2056_v52 = vpop.f32.mrf.mxu0  ;;  %1845 = vst [vmem:[%s3970_s3 + $0xa8] sm:$0xff] %v2080_v11 }
 0x2a5   : > { %1829 = vst [vmem:[%s3970_s3 + $0x28] sm:$0xff] %v2056_v52  ;;  %v1765_v45 = vpop.f32.mrf.mxu1 }
 0x2a6   : > { %v1685_v43 = vpop.f32.mrf.mxu0  ;;  %1844 = vst [vmem:[%s3970_s3 + $0xa0] sm:$0xff] %v1765_v45 }
 0x2a7   : > { %1828 = vst [vmem:[%s3970_s3 + $0x20] sm:$0xff] %v1685_v43 }
 0x2c7   : > { %v2083_v49 = vpop.f32.mrf.mxu1 }
 0x2c8   : > { %v2059_v55 = vpop.f32.mrf.mxu0  ;;  %1847 = vst [vmem:[%s3970_s3 + $0xb8] sm:$0xff] %v2083_v49 }
 0x2c9   : > { %1831 = vst [vmem:[%s3970_s3 + $0x38] sm:$0xff] %v2059_v55  ;;  %v1775_v16 = vpop.f32.mrf.mxu1 }
 0x2ca   : > { %v1695_v50 = vpop.f32.mrf.mxu0  ;;  %1846 = vst [vmem:[%s3970_s3 + $0xb0] sm:$0xff] %v1775_v16 }
 0x2cb   : > { %1830 = vst [vmem:[%s3970_s3 + $0x30] sm:$0xff] %v1695_v50 }
 0x2eb   : > { %v2086_v36 = vpop.f32.mrf.mxu1 }
 0x2ec   : > { %v2062_v35 = vpop.f32.mrf.mxu0  ;;  %1849 = vst [vmem:[%s3970_s3 + $0xc8] sm:$0xff] %v2086_v36 }
 0x2ed   : > { %1833 = vst [vmem:[%s3970_s3 + $0x48] sm:$0xff] %v2062_v35  ;;  %v1785_v13 = vpop.f32.mrf.mxu1 }
 0x2ee   : > { %v1705_v32 = vpop.f32.mrf.mxu0  ;;  %1848 = vst [vmem:[%s3970_s3 + $0xc0] sm:$0xff] %v1785_v13 }
 0x2ef   : > { %1832 = vst [vmem:[%s3970_s3 + $0x40] sm:$0xff] %v1705_v32 }
 0x30f   : > { %v2089_v31 = vpop.f32.mrf.mxu1 }
 0x310   : > { %v2065_v19 = vpop.f32.mrf.mxu0  ;;  %1851 = vst [vmem:[%s3970_s3 + $0xd8] sm:$0xff] %v2089_v31 }
 0x311   : > { %1835 = vst [vmem:[%s3970_s3 + $0x58] sm:$0xff] %v2065_v19  ;;  %v1795_v39 = vpop.f32.mrf.mxu1 }
 0x312   : > { %v1715_v20 = vpop.f32.mrf.mxu0  ;;  %1850 = vst [vmem:[%s3970_s3 + $0xd0] sm:$0xff] %v1795_v39 }
 0x313   : > { %1834 = vst [vmem:[%s3970_s3 + $0x50] sm:$0xff] %v1715_v20 }
 0x333   : > { %v2092_v22 = vpop.f32.mrf.mxu1 }
 0x334   : > { %v2068_v57 = vpop.f32.mrf.mxu0  ;;  %1853 = vst [vmem:[%s3970_s3 + $0xe8] sm:$0xff] %v2092_v22 }
 0x335   : > { %1837 = vst [vmem:[%s3970_s3 + $0x68] sm:$0xff] %v2068_v57  ;;  %v1805_v1 = vpop.f32.mrf.mxu1 }
 0x336   : > { %v1725_v61 = vpop.f32.mrf.mxu0  ;;  %1852 = vst [vmem:[%s3970_s3 + $0xe0] sm:$0xff] %v1805_v1 }
 0x337   : > { %1836 = vst [vmem:[%s3970_s3 + $0x60] sm:$0xff] %v1725_v61 }
 0x34f   : > { %v2095_v62 = vpop.f32.mrf.mxu1 }
 0x350   : > { %v2071_v28 = vpop.f32.mrf.mxu0  ;;  %1855 = vst [vmem:[%s3970_s3 + $0xf8] sm:$0xff] %v2095_v62 }
 0x351   : > { %1839 = vst [vmem:[%s3970_s3 + $0x78] sm:$0xff] %v2071_v28  ;;  %v1815_v33 = vpop.f32.mrf.mxu1 }
 0x352   : > { %v1735_v37 = vpop.f32.mrf.mxu0  ;;  %1854 = vst [vmem:[%s3970_s3 + $0xf0] sm:$0xff] %v1815_v33 }
 0x353   : > { %1838 = vst [vmem:[%s3970_s3 + $0x70] sm:$0xff] %v1735_v37 }
 0x354   : > { %2204 = shalt.err (!%p2201_p5)
}
 0x355   : > { %s2205_s23 = scalar_lea.hbm %s4066_s8, 4096  ;;  %s2209_s26 = scalar_lea.hbm %s4123_s2, 8192 }
 0x356   : > { %p2206_p6 = scmp.ne.s32.totalorder %s4066_s8, %s2205_s23  ;;  %p2210_p10 = scmp.lt.s32.totalorder %s4066_s8, %s4123_s2 }
 0x357   : > { %p2211_p11 = scmp.lt.s32.totalorder %s2209_s26, %s2205_s23 }
 0x358   : > { %p2207_p7 = pnand %p2206_p6, %p2334_p4 }
 0x359   : > { %p2212_p12 = por %p2211_p11, %p2210_p10 }
 0x35a   : > { %p2208_p9 = pneg %p2207_p7 }
 0x35c   : > { %p2213_p13 = pnand %p2212_p12, %p2208_p9 }
 0x35e   : > { %2216 = shalt.err (!%p2213_p13)
}
 0x35f   : > { %s2278_s30 = smov 128  }
 0x360   : > { %2107 = dma.vmem_to_hbm [thread:$0]  (%p2334_p4), %s4069_s5, 4096, %s4066_s8, %s4075_s12, %s2278_s30, %s2278_s30, %s2270_s29  }
 0x361 PF: > { %p2113_p0 = scmp.ge.s32.totalorder %s2267_s14, 2  ;;  %s1888_s3 = sand.u32 1, %s2247_s9  }
 0x362   : > { %s1889_s4 = scalar_lea.sflag [#allocation3], %s1888_s3 }
 0x363   : > { %p2110_p1 = pnand %p2113_p0, %p2341_p8 }
 0x365   : > { %p2111_p2 = pneg %p2110_p1 }
 0x367   : > { %2242 = dma.done.wait (%p2111_p2), %s1889_s4, 4096  }
 0x368   : > { %2244 = vsyncadd (%p2111_p2), %s1889_s4, 4294963200  ;;  %s15_s14 = sadd.s32 1, %s2267_s14   ;;  %s4406_s9 = smov %s2251_s10 }
 0x369   : > { %p12_p3 = scmp.ge.s32.totalorder %s15_s14, 4   ;;  %s4407_s10 = smov %s2255_s11 }
 0x36a   : > { %s4408_s11 = smov %s2347_s22  ;;  %s4409_s12 = smov %s2263_s13 }
 0x36b   : > { %s4410_s13 = smov %s4412_s17  ;;  %14 = sbr.rel (!%p12_p3) target bundleno = 4 (0x4), region = 63 }
 0x370   :  { %1894 = vsyncpa [#allocation3], 1 }
 0x371   :  { %1896 = vsyncpa [#allocation3 + $0x1], 1 }

</bundles_post_ra>
